<compile_context>
chip_gen: v6e
topology: v6e:2x2x1
jax: 0.10.0
libtpu: 0.0.40
codegen_flags: <defaults>
</compile_context>

<pallas_src>
import functools

import jax
import jax.numpy as jnp
from jax import lax
from jax.experimental import pallas as pl
from jax.experimental.pallas import tpu as pltpu

POOL_W = 64  # nn.MaxPool2d(kernel_size=[1, 64], stride=[1, 64])


def _pick_batch_tile(B):
    """Rows per grid step: divides B exactly, keeps >=2 grid steps when B >= 2."""
    for tb in (8, 4, 2, 1):
        if B % tb == 0 and (B // tb >= 2 or B == tb == 1):
            return tb
    return 1


def _head_kernel(apply_softmax, tb, x_ref, wlo_ref, whi_ref, b_ref, o_ref):
    # x_ref:   [tb, R, 128]  activation rows (two 64-wide pool windows per 128 lanes)
    # wlo_ref: [L, R]        fc weight columns 2m   (pairs with the lane 0..63 max)
    # whi_ref: [L, R]        fc weight columns 2m+1 (pairs with the lane 64..127 max)
    # b_ref:   [L, 1]        fc bias (f32)
    # o_ref:   [tb, L, 1]    logits / probs (f32)
    w_lo = wlo_ref[...]
    w_hi = whi_ref[...]
    bias = b_ref[...]
    dn = (((1,), (0,)), ((), ()))  # [L, R] x [R, 1] -> [L, 1]

    for j in range(tb):  # tb is a small static constant -> unrolled
        x = x_ref[j]                                               # [R, 128]
        # MaxPool2d([1,64],[1,64]): max over each 64-lane half of every row.
        lo = jnp.max(x[:, :POOL_W], axis=1, keepdims=True)         # [R, 1] (p = 2c)
        hi = jnp.max(x[:, POOL_W:], axis=1, keepdims=True)         # [R, 1] (p = 2c+1)
        # nn.Linear(S*P, L): contract over the flattened feature axis, f32 accumulate.
        col = lax.dot_general(w_lo, lo, dn, preferred_element_type=jnp.float32)
        col = col + lax.dot_general(w_hi, hi, dn, preferred_element_type=jnp.float32)
        col = col + bias                                           # [L, 1] f32
        if apply_softmax:  # nn.Softmax(dim=1), eval mode only
            m = jnp.max(col, axis=0, keepdims=True)
            e = jnp.exp(col - m)
            s = jnp.sum(e, axis=0, keepdims=True)
            col = e * pl.reciprocal(s, approx=True)
        o_ref[j] = col.astype(o_ref.dtype)


def bert_classification_pool_head(last_hidden_state, fc_w, fc_b, mode="train"):
    """last_hidden_state: [B, S, H] (f32 or bf16); fc_w: [num_labels, S*(H//64)]
    (torch layout); fc_b: [num_labels]. Returns logits (train) or softmax probs
    (otherwise), shape [B, num_labels], f32."""
    B, S, H = last_hidden_state.shape
    assert H % (2 * POOL_W) == 0, "lane-pair pooling layout needs H % 128 == 0"
    P = H // POOL_W
    L = int(fc_b.shape[0])
    assert fc_w.shape == (L, S * P)

    R = (S * H) // 128                  # == S * P // 2
    act_dtype = last_hidden_state.dtype

    # FREE contiguous reshape (no transpose, no HBM round trip): x2[b, m, q] with
    # m = s*(H//128) + c holds pool window p=2c in lanes q<64 and p=2c+1 in q>=64.
    x2 = last_hidden_state.reshape(B, R, 128)

    # Tiny weight plumbing (done once, a few tens of KiB): de-interleave even/odd
    # flattened-feature columns so no in-kernel shuffle is needed.  Flat feature
    # f = s*P + p pairs with row m = f//2 -> column 2m <-> "lo", 2m+1 <-> "hi".
    wr = fc_w.reshape(L, R, 2)
    w_lo = wr[:, :, 0].astype(act_dtype)            # [L, R]
    w_hi = wr[:, :, 1].astype(act_dtype)            # [L, R]
    b_col = fc_b.astype(jnp.float32).reshape(L, 1)  # [L, 1]

    tb = _pick_batch_tile(B)
    grid = (B // tb,)

    kernel = functools.partial(_head_kernel, mode != "train", tb)
    out = pl.pallas_call(
        kernel,
        out_shape=jax.ShapeDtypeStruct((B, L, 1), jnp.float32),
        grid=grid,
        in_specs=[
            pl.BlockSpec((tb, R, 128), lambda i: (i, 0, 0)),  # activation tile
            pl.BlockSpec((L, R), lambda i: (0, 0)),           # resident weights
            pl.BlockSpec((L, R), lambda i: (0, 0)),
            pl.BlockSpec((L, 1), lambda i: (0, 0)),           # resident bias
        ],
        out_specs=pl.BlockSpec((tb, L, 1), lambda i: (i, 0, 0)),
        compiler_params=pltpu.CompilerParams(
            dimension_semantics=("parallel",),  # megacore batch sharding on v7x
        ),
    )(x2, w_lo, w_hi, b_col)
    return out[:, :, 0]


if __name__ == "__main__":
    # Shapes implied by the module: fc in_features = 12 * 128 = (768 // 64) * 128
    # => seq_len S = 128, hidden H = 768 (BERT-base). Small batch, small label count.
    B, S, H, L = 2, 128, 768, 4
    P = H // POOL_W

    key = jax.random.PRNGKey(0)
    k1, k2, k3 = jax.random.split(key, 3)
    last_hidden_state = jax.random.normal(k1, (B, S, H), dtype=jnp.float32)
    fc_w = 0.02 * jax.random.normal(k2, (L, S * P), dtype=jnp.float32)
    fc_b = 0.02 * jax.random.normal(k3, (L,), dtype=jnp.float32)

    # NOTE: benchmark end-to-end with xprof (sum all XLA ops for the jit), not just
    # the Pallas custom call — wrapper ops / launch overhead dominate at these sizes.
    logits = bert_classification_pool_head(last_hidden_state, fc_w, fc_b, mode="train")
    probs = bert_classification_pool_head(last_hidden_state, fc_w, fc_b, mode="eval")
    jax.block_until_ready((logits, probs))

    # Pure-JAX reference (same semantics as the torch head).
    pooled_ref = jnp.max(last_hidden_state.reshape(B, S, P, POOL_W), axis=-1)
    flat_ref = pooled_ref.reshape(B, S * P)
    logits_ref = flat_ref @ fc_w.T + fc_b
    probs_ref = jax.nn.softmax(logits_ref, axis=1)
    assert jnp.allclose(logits, logits_ref, atol=5e-4, rtol=5e-4)
    assert jnp.allclose(probs, probs_ref, atol=5e-3, rtol=5e-3)

    # bf16 activations path (upstream encoder emitting bf16): halves HBM traffic;
    # matmul still accumulates in f32 inside the kernel.
    lh_bf16 = last_hidden_state.astype(jnp.bfloat16)
    logits_bf16 = bert_classification_pool_head(lh_bf16, fc_w, fc_b, mode="train")
    jax.block_until_ready(logits_bf16)
    flat_bf = jnp.max(lh_bf16.astype(jnp.float32).reshape(B, S, P, POOL_W), axis=-1)
    logits_bf_ref = (flat_bf.reshape(B, S * P)
                     @ fc_w.astype(jnp.bfloat16).astype(jnp.float32).T) + fc_b
    assert jnp.allclose(logits_bf16, logits_bf_ref, atol=2e-2, rtol=2e-2)

    print("KERNEL_OK")
</pallas_src>

<mosaic_0001>
module attributes {stable_mosaic.version = 11 : i64} {
  func.func @_head_kernel(%arg0: i32, %arg1: memref<1x768x128xf32, #tpu.memory_space<vmem>>, %arg2: memref<4x768xf32, #tpu.memory_space<vmem>>, %arg3: memref<4x768xf32, #tpu.memory_space<vmem>>, %arg4: memref<4x1xf32, #tpu.memory_space<vmem>>, %arg5: memref<1x4x1xf32, #tpu.memory_space<vmem>>) attributes {dimension_semantics = [#tpu.dimension_semantics<parallel>], iteration_bounds = array<i64: 2>, scalar_prefetch = 0 : i64, scratch_operands = 0 : i64, tpu.core_type = #tpu.core_type<tc>, window_params = [{transform_indices = @transform_0, window_bounds = array<i64: 1, 768, 128>}, {pipeline_mode = #tpu.pipeline_mode<synchronous>, transform_indices = @transform_1, window_bounds = array<i64: 4, 768>}, {pipeline_mode = #tpu.pipeline_mode<synchronous>, transform_indices = @transform_2, window_bounds = array<i64: 4, 768>}, {pipeline_mode = #tpu.pipeline_mode<synchronous>, transform_indices = @transform_3, window_bounds = array<i64: 4, 1>}, {transform_indices = @transform_4, window_bounds = array<i64: 1, 4, 1>}]} {
    %c0 = arith.constant 0 : index
    %c0_0 = arith.constant 0 : index
    %0 = vector.load %arg2[%c0, %c0_0] : memref<4x768xf32, #tpu.memory_space<vmem>>, vector<4x768xf32>
    %c0_1 = arith.constant 0 : index
    %c0_2 = arith.constant 0 : index
    %1 = vector.load %arg3[%c0_1, %c0_2] : memref<4x768xf32, #tpu.memory_space<vmem>>, vector<4x768xf32>
    %c0_3 = arith.constant 0 : index
    %c0_4 = arith.constant 0 : index
    %2 = vector.load %arg4[%c0_3, %c0_4] : memref<4x1xf32, #tpu.memory_space<vmem>>, vector<4x1xf32>
    %c0_5 = arith.constant 0 : index
    %c0_6 = arith.constant 0 : index
    %c0_7 = arith.constant 0 : index
    %3 = vector.load %arg1[%c0_5, %c0_6, %c0_7] : memref<1x768x128xf32, #tpu.memory_space<vmem>>, vector<1x768x128xf32>
    %4 = vector.shape_cast %3 : vector<1x768x128xf32> to vector<768x128xf32>
    %5 = vector.extract_strided_slice %4 {offsets = [0, 0], sizes = [768, 64], strides = [1, 1]} : vector<768x128xf32> to vector<768x64xf32>
    %cst = arith.constant dense<0xFF800000> : vector<768xf32>
    %6 = vector.multi_reduction <maximumf>, %5, %cst [1] : vector<768x64xf32> to vector<768xf32>
    %7 = vector.shape_cast %6 : vector<768xf32> to vector<768x1xf32>
    %8 = vector.extract_strided_slice %4 {offsets = [0, 64], sizes = [768, 64], strides = [1, 1]} : vector<768x128xf32> to vector<768x64xf32>
    %cst_8 = arith.constant dense<0xFF800000> : vector<768xf32>
    %9 = vector.multi_reduction <maximumf>, %8, %cst_8 [1] : vector<768x64xf32> to vector<768xf32>
    %10 = vector.shape_cast %9 : vector<768xf32> to vector<768x1xf32>
    %cst_9 = arith.constant dense<0.000000e+00> : vector<4x1xf32>
    %11 = tpu.matmul %0, %7, %cst_9 {dimension_numbers = #tpu.dot_dimension_numbers<[1], [0], [0], [1], [0, 0, 1, 1], [], []>} : vector<4x768xf32>, vector<768x1xf32>, vector<4x1xf32> -> vector<4x1xf32>
    %cst_10 = arith.constant dense<0.000000e+00> : vector<4x1xf32>
    %12 = tpu.matmul %1, %10, %cst_10 {dimension_numbers = #tpu.dot_dimension_numbers<[1], [0], [0], [1], [0, 0, 1, 1], [], []>} : vector<4x768xf32>, vector<768x1xf32>, vector<4x1xf32> -> vector<4x1xf32>
    %13 = arith.addf %11, %12 : vector<4x1xf32>
    %14 = arith.addf %13, %2 : vector<4x1xf32>
    %c0_11 = arith.constant 0 : index
    %c0_12 = arith.constant 0 : index
    %c0_13 = arith.constant 0 : index
    %15 = vector.load %arg5[%c0_11, %c0_12, %c0_13] : memref<1x4x1xf32, #tpu.memory_space<vmem>>, vector<1x4x1xf32>
    %16 = vector.shape_cast %15 : vector<1x4x1xf32> to vector<4x1xf32>
    %17 = vector.shape_cast %14 : vector<4x1xf32> to vector<1x4x1xf32>
    tpu.vector_store %arg5[%c0_11, %c0_12, %c0_13], %17 {strides = array<i32>} : memref<1x4x1xf32, #tpu.memory_space<vmem>>, vector<1x4x1xf32>,
    return
  }
  func.func @transform_0(%arg0: i32) -> (i32, i32, i32) {
    %c0_i32 = arith.constant 0 : i32
    %c0_i32_0 = arith.constant 0 : i32
    %c0_i32_1 = arith.constant 0 : i32
    return %arg0, %c0_i32, %c0_i32_0 : i32, i32, i32
  }
  func.func @transform_1(%arg0: i32) -> (i32, i32) {
    %c0_i32 = arith.constant 0 : i32
    %c0_i32_0 = arith.constant 0 : i32
    %c0_i32_1 = arith.constant 0 : i32
    return %c0_i32, %c0_i32_0 : i32, i32
  }
  func.func @transform_2(%arg0: i32) -> (i32, i32) {
    %c0_i32 = arith.constant 0 : i32
    %c0_i32_0 = arith.constant 0 : i32
    %c0_i32_1 = arith.constant 0 : i32
    return %c0_i32, %c0_i32_0 : i32, i32
  }
  func.func @transform_3(%arg0: i32) -> (i32, i32) {
    %c0_i32 = arith.constant 0 : i32
    %c0_i32_0 = arith.constant 0 : i32
    %c0_i32_1 = arith.constant 0 : i32
    return %c0_i32, %c0_i32_0 : i32, i32
  }
  func.func @transform_4(%arg0: i32) -> (i32, i32, i32) {
    %c0_i32 = arith.constant 0 : i32
    %c0_i32_0 = arith.constant 0 : i32
    %c0_i32_1 = arith.constant 0 : i32
    return %arg0, %c0_i32, %c0_i32_0 : i32, i32, i32
  }
}

</mosaic_0001>

<bundles_post_ra>
// kernel: tpu_custom_call.1
= control target key start
LH: loop header
LB: loop body
LE: loop exit
PB: predicated region body
PF: predicated region fallthrough
CT: control target
= control target key end

     0   :  { %9 = vsyncpa [#allocation3], 0  ;;  %s2764_s0 = inlined_call_operand.hbm [shape: f32[2,768,128], index: 0, kind: input, shape index: {}]   ;;  %s2765_s1 = inlined_call_operand.hbm [shape: f32[4,768], index: 1, kind: input, shape index: {}]   ;;  %s2766_s2 = inlined_call_operand.hbm [shape: f32[4,768], index: 2, kind: input, shape index: {}]   ;;  %s2767_s3 = inlined_call_operand.vmem [shape: f32[4,1], index: 3, kind: input, shape index: {}]   ;;  %s2768_s4 = inlined_call_operand.vmem [shape: f32[2,4,1], index: 4, kind: output, shape index: {}]  }
   0x1   :  { %11 = vsyncpa [#allocation3 + $0x1], 0 }
   0x2   :  { %12 = vsyncpa [#allocation5], 0  ;;  %s1890_s15 = smov 0   ;;  %s1892_s16 = smov 0  }
   0x3   :  { %s1894_s17 = smov 0   ;;  %s1896_s18 = smov 0  }
   0x4 LB: > { %s1909_s19 = sadd.s32 4294967295, %s1858_s18   ;;  %s1912_s20 = sadd.s32 1, %s1858_s18   ;;  %s1858_s18 = sphi %s1896_s18, %s2841_s18   ;;  %s1854_s17 = sphi %s1894_s17, %s2840_s17   ;;  %s1850_s16 = sphi %s1892_s16, %s2839_s16   ;;  %s1846_s15 = sphi %s1890_s15, %s2838_s15  }
   0x5   : > { %s22_s21 = ssub.s32 %s1858_s18, %s1912_s20  ;;  %s25_s22 = sadd.s32 1, %s1854_s17 }
   0x6   : > { %p23_p0 = scmp.eq.s32.totalorder %s22_s21, 0  ;;  %p32_p1 = scmp.ne.s32.totalorder %s1854_s17, %s1850_s16 }
   0x7   : > { %p33_p2 = scmp.eq.s32.totalorder %s1858_s18, 0  ;;  %p38_p3 = scmp.ne.s32.totalorder %s1850_s16, %s1846_s15 }
   0x8   : > { %s1922_s23 = scalar_select %p23_p0, %s1854_s17, %s25_s22  }
   0x9   : > { %p1924_p4 = por %p33_p2, %p32_p1  ;;  %p2769_p5 = scmp.eq.s32.totalorder %s1909_s19, 0 }
   0xa   : > { %p1448_p6 = scmp.ge.s32.totalorder %s1858_s18, 1  ;;  %p138_p7 = scmp.lt.s32.totalorder %s1858_s18, 3 }
   0xb   : > { %p1933_p8 = por %p2769_p5, %p38_p3  ;;  %s1860_s27 = smov [#allocation4]  }
   0xc   : > { %p1937_p9 = pnand %p1448_p6, %p138_p7  ;;  %s151_s28 = sshll.u32 %s1860_s27, 4  ;;  %s152_s28 = int_to_ptr.vmem [resolvable:$true] %s151_s28 }
   0xd   : > { %s2787_s25 = scalar_select %p1933_p8, 1, 0 }
   0xe   : > { %s2788_s26 = scalar_select %p1937_p9, 1, 0 }
   0xf   : > { %p1682_p10 = pneg %p1937_p9  ;;  %p1695_p11 = scmp.lt.s32.totalorder %s1858_s18, 2 }
  0x10   : > { %s1861_s30 = smov [#allocation6]   ;;  %s176_s7 = sand.u32 1, %s1854_s17  }
  0x11   : > { %p1946_p12 = pnand %p1682_p10, %p2769_p5  ;;  %s162_s5 = sshll.u32 %s1861_s30, 4  ;;  %s163_s5 = int_to_ptr.vmem [resolvable:$true] %s162_s5 }
  0x12   : > { %p1952_p13 = pnand %p1695_p11, %p1924_p4  ;;  %s1751_s8 = scalar_lea.vmem %s152_s28, 384 }
  0x13   : > { %p1742_p0 = pneg %p1946_p12  ;;  %p1752_p1 = scmp.ne.s32.totalorder %s152_s28, %s1751_s8 }
  0x14   : > { %s2790_s6 = scalar_select %p1952_p13, 1, 0 }
  0x15   : > { %p1754_p2 = pnand %p1752_p1, %p1742_p0  ;;  %p1759_p6 = scmp.lt.s32.totalorder %s152_s28, %s152_s28 }
  0x16   : > { %p1760_p7 = scmp.lt.s32.totalorder %s1751_s8, %s1751_s8 }
  0x17   : > { %p1755_p3 = pneg %p1754_p2 }
  0x18   : > { %p1761_p10 = por %p1760_p7, %p1759_p6 }
  0x1a   : > { %p1762_p5 = pnand %p1761_p10, %p1755_p3 }
  0x1c   : > { %1765 = shalt.err (!%p1762_p5)
}
  0x1d   : > { %1685 = dma.hbm_to_vmem [thread:$0]  (!%p1946_p12), %s2765_s1, 384, %s152_s28, [#allocation5]  }
  0x1e   : > { %s1777_s11 = scalar_lea.vmem %s163_s5, 384  ;;  %p1785_p1 = scmp.lt.s32.totalorder %s163_s5, %s163_s5 }
  0x1f   : > { %p1778_p4 = scmp.ne.s32.totalorder %s163_s5, %s1777_s11  ;;  %p1786_p2 = scmp.lt.s32.totalorder %s1777_s11, %s1777_s11 }
  0x21   : > { %p1780_p11 = pnand %p1778_p4, %p1742_p0  ;;  %p1787_p9 = por %p1786_p2, %p1785_p1 }
  0x23   : > { %p1781_p8 = pneg %p1780_p11 }
  0x25   : > { %p1788_p13 = pnand %p1787_p9, %p1781_p8 }
  0x27   : > { %1791 = shalt.err (!%p1788_p13)
}
  0x28   : > { %1688 = dma.hbm_to_vmem [thread:$0]  (!%p1946_p12), %s2766_s2, 384, %s163_s5, [#allocation5]  }
  0x29   : > { %s1669_s14 = smul.u32 768, %s176_s7  ;;  %s1983_s29 = scalar_lea.sflag [#allocation3], %s176_s7 }
  0x2a   : > { %s1670_s15 = smul.u32 12288, %s1858_s18  ;;  %p2791_p8 = scmp.ne.s32.totalorder %s2790_s6, 0 }
  0x2b   : > { %s180_s27 = scalar_lea.vmem [#allocation2], %s1669_s14  ;;  %s1797_s8 = scalar_lea.hbm %s2764_s0, 24576 }
  0x2c   : > { %s1979_s24 = scalar_lea.hbm %s2764_s0, %s1670_s15  ;;  %s187_s28 = sshll.u32 %s180_s27, 4  ;;  %s1981_s28 = int_to_ptr.vmem [resolvable:$true] %s187_s28 }
  0x2d   : > { %s1792_s30 = scalar_lea.hbm %s1979_s24, 12288  ;;  %p1794_p9 = pneg %p2791_p8 }
  0x2e   : > { %p1793_p5 = scmp.ne.s32.totalorder %s1979_s24, %s1792_s30  ;;  %p1798_p0 = scmp.lt.s32.totalorder %s1979_s24, %s2764_s0 }
  0x2f   : > { %p1799_p3 = scmp.lt.s32.totalorder %s1797_s8, %s1792_s30 }
  0x30   : > { %p1795_p12 = pnand %p1794_p9, %p1793_p5 }
  0x31   : > { %p1800_p6 = por %p1799_p3, %p1798_p0 }
  0x32   : > { %p1796_p13 = pneg %p1795_p12 }
  0x34   : > { %p1801_p7 = pnand %p1800_p6, %p1796_p13 }
  0x36   : > { %1804 = shalt.err (!%p1801_p7)
}
  0x37   : > { %s1805_s7 = scalar_lea.vmem %s1981_s28, 12288  ;;  %s1862_s11 = smov [#allocation2]  }
  0x38   : > { %p1806_p10 = scmp.ne.s32.totalorder %s1981_s28, %s1805_s7  ;;  %s1810_s12 = sshll.u32 %s1862_s11, 4  ;;  %s1811_s12 = int_to_ptr.vmem [resolvable:$false] %s1810_s12 }
  0x39   : > { %s1812_s13 = scalar_lea.vmem %s1811_s12, 24576  ;;  %p1813_p1 = scmp.lt.s32.totalorder %s1981_s28, %s1811_s12 }
  0x3a   : > { %p1808_p4 = pnand %p1806_p10, %p1794_p9  ;;  %p1814_p2 = scmp.lt.s32.totalorder %s1812_s13, %s1805_s7 }
  0x3c   : > { %p1809_p11 = pneg %p1808_p4  ;;  %p1815_p5 = por %p1814_p2, %p1813_p1 }
  0x3e   : > { %p1816_p12 = pnand %p1815_p5, %p1809_p11 }
  0x40   : > { %1819 = shalt.err (!%p1816_p12)
}
  0x41   : > { %s1863_s14 = smov 128   ;;  %s1864_s15 = smov 8  }
  0x42   : > { %1692 = dma.hbm_to_vmem [thread:$0]  (!%p2791_p8), %s1979_s24, 12288, %s1981_s28, %s1983_s29, %s1863_s14, %s1863_s14, %s1864_s15  }
  0x43   : > { %p2792_p9 = scmp.ne.s32.totalorder %s2788_s26, 0 }
  0x45   : > { %199 = sbr.rel (%p2792_p9) target bundleno = 806 (0x326), region = 36 }
  0x4a   : > { %s201_s21 = sand.u32 1, %s1850_s16   ;;  %p2793_p13 = scmp.ne.s32.totalorder %s2787_s25, 0 }
  0x4b   : > { %s1671_s22 = smul.u32 768, %s201_s21  ;;  %s202_s27 = scalar_lea.sflag [#allocation3], %s201_s21 }
  0x4d   : > { %s2007_s30 = scalar_lea.vmem [#allocation2], %s1671_s22 }
  0x4e   : > { %1837 = dma.done.wait (%p2793_p13), %s202_s27, 12288  }
  0x4f   : > { %1839 = vsyncadd (%p2793_p13), %s202_s27, 4294955008  ;;  %p2794_p0 = scmp.eq.s32.totalorder %s1909_s19, 0 }
  0x51   : > { %1841 = dma.done.wait (%p2794_p0), [#allocation5], 768   ;;  %p2795_p8 = pmov %p2794_p0 }
  0x52   : > { %vm344_vm0 = vcmask 523264   ;;  %v2018_v0 = vld [vmem:[%s2007_s30 + $0x10] sm:$0xff]  ;;  %v2021_v1 = vld [vmem:[%s2007_s30] sm:$0xff]  ;;  %v2024_v2 = vld [vmem:[%s2007_s30 + $0x18] sm:$0xff]  ;;  %vm633_vm1 = vcmask 1048064   ;;  %p237_p3 = scmp.lt.s32.totalorder %s1909_s19, 1 }
  0x53   : > { %1843 = vsyncadd (%p2795_p8), [#allocation5], 4294966528  ;;  %v351_v3 = vsel %vm344_vm0, %v2018_v0, -inf  ;;  %v345_v4 = vsel %vm344_vm0, %v2021_v1, -inf  ;;  %v2031_v5 = vld [vmem:[%s2007_s30 + $0x8] sm:$0xff]  ;;  %v354_v6 = vsel %vm344_vm0, %v2024_v2, -inf }
  0x54   : > { %352 = vmax.xlane.f32.xlu1 %v351_v3  ;;  %346 = vmax.xlane.f32.xlu0 %v345_v4  ;;  %v348_v7 = vsel %vm344_vm0, %v2031_v5, -inf  ;;  %v2038_v8 = vld [vmem:[%s2007_s30 + $0x28] sm:$0xff]  ;;  %v2041_v9 = vld [vmem:[%s2007_s30 + $0x20] sm:$0xff]  ;;  %v2048_v12 = vld [vmem:[%s2007_s30 + $0x38] sm:$0xff]  ;;  %s2843_s19 = smov (!%p237_p3, %s1909_s19), 1  ;;  %vm1361_vm2 = vcmask 3072  }
  0x55   : > { %v360_v10 = vsel %vm344_vm0, %v2038_v8, -inf  ;;  %v357_v11 = vsel %vm344_vm0, %v2041_v9, -inf  ;;  %v2051_v13 = vld [vmem:[%s2007_s30 + $0x30] sm:$0xff]  ;;  %v366_v14 = vsel %vm344_vm0, %v2048_v12, -inf  ;;  %v2058_v16 = vld [vmem:[%s2007_s30 + $0x78] sm:$0xff]  ;;  %v2091_v29 = vld [vmem:[%s2007_s30 + $0xe8] sm:$0xff] }
  0x56   : > { %v363_v15 = vsel %vm344_vm0, %v2051_v13, -inf  ;;  %v2061_v17 = vld [vmem:[%s2007_s30 + $0xf8] sm:$0xff]  ;;  %v679_v18 = vsel %vm633_vm1, %v2058_v16, -inf  ;;  %v2071_v21 = vld [vmem:[%s2007_s30 + $0xf0] sm:$0xff]  ;;  %v721_v31 = vsel %vm633_vm1, %v2091_v29, -inf  ;;  %v2101_v33 = vld [vmem:[%s2007_s30 + $0x68] sm:$0xff] }
  0x57   : > { %v727_v19 = vsel %vm633_vm1, %v2061_v17, -inf  ;;  %v2068_v20 = vld [vmem:[%s2007_s30 + $0x1f8] sm:$0xff]  ;;  %v724_v23 = vsel %vm633_vm1, %v2071_v21, -inf  ;;  %v2081_v25 = vld [vmem:[%s2007_s30 + $0x70] sm:$0xff]  ;;  %v673_v35 = vsel %vm633_vm1, %v2101_v33, -inf  ;;  %v2108_v36 = vld [vmem:[%s2007_s30 + $0x1e8] sm:$0xff] }
  0x58   : > { %355 = vmax.xlane.f32.xlu1 %v354_v6  ;;  %349 = vmax.xlane.f32.xlu0 %v348_v7  ;;  %v823_v22 = vsel %vm633_vm1, %v2068_v20, -inf  ;;  %v2078_v24 = vld [vmem:[%s2007_s30 + $0x178] sm:$0xff]  ;;  %v676_v27 = vsel %vm633_vm1, %v2081_v25, -inf  ;;  %v2088_v28 = vld [vmem:[%s2007_s30 + $0x1f0] sm:$0xff]  ;;  %v2111_v37 = vld [vmem:[%s2007_s30 + $0xe0] sm:$0xff]  ;;  %v817_v38 = vsel %vm633_vm1, %v2108_v36, -inf }
  0x59   : > { %v775_v26 = vsel %vm633_vm1, %v2078_v24, -inf  ;;  %v820_v30 = vsel %vm633_vm1, %v2088_v28, -inf  ;;  %v2098_v32 = vld [vmem:[%s2007_s30 + $0x170] sm:$0xff]  ;;  %v718_v39 = vsel %vm633_vm1, %v2111_v37, -inf  ;;  %v2118_v40 = vld [vmem:[%s2007_s30 + $0x168] sm:$0xff]  ;;  %v2121_v41 = vld [vmem:[%s2007_s30 + $0x60] sm:$0xff] }
  0x5a   : > { %v772_v34 = vsel %vm633_vm1, %v2098_v32, -inf  ;;  %v769_v42 = vsel %vm633_vm1, %v2118_v40, -inf  ;;  %v670_v43 = vsel %vm633_vm1, %v2121_v41, -inf  ;;  %v2128_v44 = vld [vmem:[%s2007_s30 + $0x1e0] sm:$0xff]  ;;  %v2131_v45 = vld [vmem:[%s2007_s30 + $0xd8] sm:$0xff]  ;;  %v2151_v53 = vld [vmem:[%s2007_s30 + $0xd0] sm:$0xff] }
  0x5b   : > { %v814_v46 = vsel %vm633_vm1, %v2128_v44, -inf  ;;  %v715_v47 = vsel %vm633_vm1, %v2131_v45, -inf  ;;  %v2138_v48 = vld [vmem:[%s2007_s30 + $0x160] sm:$0xff]  ;;  %v2141_v49 = vld [vmem:[%s2007_s30 + $0x58] sm:$0xff]  ;;  %v712_v55 = vsel %vm633_vm1, %v2151_v53, -inf  ;;  %v2161_v57 = vld [vmem:[%s2007_s30 + $0x50] sm:$0xff] }
  0x5c   : > { %361 = vmax.xlane.f32.xlu1 %v360_v10  ;;  %358 = vmax.xlane.f32.xlu0 %v357_v11  ;;  %v766_v50 = vsel %vm633_vm1, %v2138_v48, -inf  ;;  %v667_v51 = vsel %vm633_vm1, %v2141_v49, -inf  ;;  %v2148_v52 = vld [vmem:[%s2007_s30 + $0x1d8] sm:$0xff]  ;;  %v664_v59 = vsel %vm633_vm1, %v2161_v57, -inf  ;;  %v2168_v60 = vld [vmem:[%s2007_s30 + $0x1d0] sm:$0xff]  ;;  %v2171_v61 = vld [vmem:[%s2007_s30 + $0xc8] sm:$0xff] }
  0x5d   : > { %v811_v54 = vsel %vm633_vm1, %v2148_v52, -inf  ;;  %v2158_v56 = vld [vmem:[%s2007_s30 + $0x158] sm:$0xff]  ;;  %v808_v62 = vsel %vm633_vm1, %v2168_v60, -inf  ;;  %v709_v63 = vsel %vm633_vm1, %v2171_v61, -inf  ;;  %v2178_v3 = vld [vmem:[%s2007_s30 + $0x150] sm:$0xff]  ;;  %v2181_v4 = vld [vmem:[%s2007_s30 + $0x48] sm:$0xff] }
  0x5e   : > { %v763_v58 = vsel %vm633_vm1, %v2158_v56, -inf  ;;  %v760_v6 = vsel %vm633_vm1, %v2178_v3, -inf  ;;  %v661_v7 = vsel %vm633_vm1, %v2181_v4, -inf  ;;  %v2188_v10 = vld [vmem:[%s2007_s30 + $0x1c8] sm:$0xff]  ;;  %v2191_v11 = vld [vmem:[%s2007_s30 + $0xc0] sm:$0xff]  ;;  %s1456_s25 = sshll.u32 %s2843_s19, 2 }
  0x5f   : > { %s240_s29 = scalar_lea.vmem %s2768_s4, %s1456_s25 }
  0x60   : > { %367 = vmax.xlane.f32.xlu1 %v366_v14  ;;  %364 = vmax.xlane.f32.xlu0 %v363_v15  ;;  %v805_v14 = vsel %vm633_vm1, %v2188_v10, -inf  ;;  %v706_v15 = vsel %vm633_vm1, %v2191_v11, -inf }
  0x64   : > { %680 = vmax.xlane.f32.xlu1 %v679_v18  ;;  %728 = vmax.xlane.f32.xlu0 %v727_v19  ;;  %v2198_v18 = vld [vmem:[%s2007_s30 + $0x148] sm:$0xff]  ;;  %v2201_v19 = vld [vmem:[%s2007_s30 + $0x40] sm:$0xff] }
  0x68   : > { %824 = vmax.xlane.f32.xlu1 %v823_v22  ;;  %725 = vmax.xlane.f32.xlu0 %v724_v23  ;;  %v757_v22 = vsel %vm633_vm1, %v2198_v18, -inf  ;;  %v658_v23 = vsel %vm633_vm1, %v2201_v19, -inf }
  0x6c   : > { %776 = vmax.xlane.f32.xlu1 %v775_v26  ;;  %677 = vmax.xlane.f32.xlu0 %v676_v27  ;;  %v2208_v26 = vld [vmem:[%s2007_s30 + $0x1c0] sm:$0xff]  ;;  %v2211_v27 = vld [vmem:[%s2007_s30 + $0xb8] sm:$0xff] }
  0x70   : > { %821 = vmax.xlane.f32.xlu1 %v820_v30  ;;  %722 = vmax.xlane.f32.xlu0 %v721_v31  ;;  %v802_v30 = vsel %vm633_vm1, %v2208_v26, -inf  ;;  %v703_v31 = vsel %vm633_vm1, %v2211_v27, -inf }
  0x74   : > { %773 = vmax.xlane.f32.xlu1 %v772_v34  ;;  %674 = vmax.xlane.f32.xlu0 %v673_v35  ;;  %v2218_v34 = vld [vmem:[%s2007_s30 + $0x140] sm:$0xff] }
  0x75   : > { %v754_v35 = vsel %vm633_vm1, %v2218_v34, -inf }
  0x78   : > { %818 = vmax.xlane.f32.xlu1 %v817_v38  ;;  %719 = vmax.xlane.f32.xlu0 %v718_v39  ;;  %v655_v38 = vsel %vm633_vm1, %v2048_v12, -inf  ;;  %v2225_v39 = vld [vmem:[%s2007_s30 + $0x1b8] sm:$0xff] }
  0x7c   : > { %770 = vmax.xlane.f32.xlu1 %v769_v42  ;;  %671 = vmax.xlane.f32.xlu0 %v670_v43  ;;  %v2228_v42 = vld [vmem:[%s2007_s30 + $0xb0] sm:$0xff]  ;;  %v799_v43 = vsel %vm633_vm1, %v2225_v39, -inf }
  0x80   : > { %815 = vmax.xlane.f32.xlu1 %v814_v46  ;;  %716 = vmax.xlane.f32.xlu0 %v715_v47  ;;  %v700_v46 = vsel %vm633_vm1, %v2228_v42, -inf  ;;  %v2235_v47 = vld [vmem:[%s2007_s30 + $0x138] sm:$0xff] }
  0x81   : > { %v751_v12 = vsel %vm633_vm1, %v2235_v47, -inf }
  0x84   : > { %767 = vmax.xlane.f32.xlu1 %v766_v50  ;;  %668 = vmax.xlane.f32.xlu0 %v667_v51  ;;  %v652_v50 = vsel %vm633_vm1, %v2051_v13, -inf  ;;  %v2242_v51 = vld [vmem:[%s2007_s30 + $0x1b0] sm:$0xff] }
  0x88   : > { %812 = vmax.xlane.f32.xlu1 %v811_v54  ;;  %713 = vmax.xlane.f32.xlu0 %v712_v55  ;;  %v2245_v54 = vld [vmem:[%s2007_s30 + $0xa8] sm:$0xff]  ;;  %v796_v55 = vsel %vm633_vm1, %v2242_v51, -inf }
  0x8c   : > { %764 = vmax.xlane.f32.xlu1 %v763_v58  ;;  %665 = vmax.xlane.f32.xlu0 %v664_v59  ;;  %v697_v58 = vsel %vm633_vm1, %v2245_v54, -inf  ;;  %v2252_v59 = vld [vmem:[%s2007_s30 + $0x130] sm:$0xff] }
  0x8d   : > { %v748_v13 = vsel %vm633_vm1, %v2252_v59, -inf }
  0x90   : > { %809 = vmax.xlane.f32.xlu1 %v808_v62  ;;  %710 = vmax.xlane.f32.xlu0 %v709_v63  ;;  %v649_v62 = vsel %vm633_vm1, %v2038_v8, -inf  ;;  %v2259_v63 = vld [vmem:[%s2007_s30 + $0x1a8] sm:$0xff] }
  0x94   : > { %761 = vmax.xlane.f32.xlu1 %v760_v6  ;;  %662 = vmax.xlane.f32.xlu0 %v661_v7  ;;  %v2262_v6 = vld [vmem:[%s2007_s30 + $0xa0] sm:$0xff]  ;;  %v793_v7 = vsel %vm633_vm1, %v2259_v63, -inf }
  0x98   : > { %806 = vmax.xlane.f32.xlu1 %v805_v14  ;;  %707 = vmax.xlane.f32.xlu0 %v706_v15  ;;  %v694_v14 = vsel %vm633_vm1, %v2262_v6, -inf  ;;  %v2269_v15 = vld [vmem:[%s2007_s30 + $0x128] sm:$0xff] }
  0x99   : > { %v745_v8 = vsel %vm633_vm1, %v2269_v15, -inf }
  0x9c   : > { %758 = vmax.xlane.f32.xlu1 %v757_v22  ;;  %659 = vmax.xlane.f32.xlu0 %v658_v23  ;;  %v646_v22 = vsel %vm633_vm1, %v2041_v9, -inf  ;;  %v2276_v23 = vld [vmem:[%s2007_s30 + $0x1a0] sm:$0xff] }
  0xa0   : > { %803 = vmax.xlane.f32.xlu1 %v802_v30  ;;  %704 = vmax.xlane.f32.xlu0 %v703_v31  ;;  %v2279_v30 = vld [vmem:[%s2007_s30 + $0x98] sm:$0xff]  ;;  %v790_v31 = vsel %vm633_vm1, %v2276_v23, -inf }
  0xa4   : > { %755 = vmax.xlane.f32.xlu1 %v754_v35  ;;  %656 = vmax.xlane.f32.xlu0 %v655_v38  ;;  %v691_v35 = vsel %vm633_vm1, %v2279_v30, -inf  ;;  %v2286_v38 = vld [vmem:[%s2007_s30 + $0x120] sm:$0xff] }
  0xa5   : > { %v742_v9 = vsel %vm633_vm1, %v2286_v38, -inf }
  0xa8   : > { %800 = vmax.xlane.f32.xlu1 %v799_v43  ;;  %701 = vmax.xlane.f32.xlu0 %v700_v46  ;;  %v643_v43 = vsel %vm633_vm1, %v2024_v2, -inf  ;;  %v2293_v46 = vld [vmem:[%s2007_s30 + $0x198] sm:$0xff] }
  0xa9   : > { %2796 = vst [vmem:[#allocation9_spill] sm:$0xff] %v2293_v46 }
  0xac   : > { %752 = vmax.xlane.f32.xlu1 %v751_v12  ;;  %653 = vmax.xlane.f32.xlu0 %v652_v50  ;;  %v2296_v12 = vld [vmem:[%s2007_s30 + $0x90] sm:$0xff]  ;;  %v787_v50 = vsel %vm633_vm1, %v2293_v46, -inf  ;;  %v2430_v46 = vld [vmem:[%s2007_s30 + $0x2d8] sm:$0xff] }
  0xb0   : > { %797 = vmax.xlane.f32.xlu1 %v796_v55  ;;  %698 = vmax.xlane.f32.xlu0 %v697_v58  ;;  %v688_v55 = vsel %vm633_vm1, %v2296_v12, -inf  ;;  %v2303_v58 = vld [vmem:[%s2007_s30 + $0x118] sm:$0xff] }
  0xb1   : > { %2797 = vst [vmem:[#allocation10_spill] sm:$0xff] %v2303_v58  ;;  %v739_v2 = vsel %vm633_vm1, %v2303_v58, -inf  ;;  %v2412_v58 = vld [vmem:[%s2007_s30 + $0x2e0] sm:$0xff] }
  0xb4   : > { %749 = vmax.xlane.f32.xlu1 %v748_v13  ;;  %650 = vmax.xlane.f32.xlu0 %v649_v62  ;;  %v640_v13 = vsel %vm633_vm1, %v2018_v0, -inf  ;;  %v2310_v62 = vld [vmem:[%s2007_s30 + $0x190] sm:$0xff] }
  0xb5   : > { %2798 = vst [vmem:[#allocation11_spill] sm:$0xff] %v2310_v62 }
  0xb8   : > { %794 = vmax.xlane.f32.xlu1 %v793_v7  ;;  %695 = vmax.xlane.f32.xlu0 %v694_v14  ;;  %v2313_v7 = vld [vmem:[%s2007_s30 + $0x88] sm:$0xff]  ;;  %v784_v14 = vsel %vm633_vm1, %v2310_v62, -inf }
  0xbc   : > { %746 = vmax.xlane.f32.xlu1 %v745_v8  ;;  %647 = vmax.xlane.f32.xlu0 %v646_v22  ;;  %v685_v8 = vsel %vm633_vm1, %v2313_v7, -inf  ;;  %v2320_v22 = vld [vmem:[%s2007_s30 + $0x110] sm:$0xff] }
  0xbd   : > { %2799 = vst [vmem:[#allocation12_spill] sm:$0xff] %v2320_v22  ;;  %v736_v0 = vsel %vm633_vm1, %v2320_v22, -inf }
  0xc0   : > { %791 = vmax.xlane.f32.xlu1 %v790_v31  ;;  %692 = vmax.xlane.f32.xlu0 %v691_v35  ;;  %v637_v31 = vsel %vm633_vm1, %v2031_v5, -inf  ;;  %v2327_v35 = vld [vmem:[%s2007_s30 + $0x188] sm:$0xff] }
  0xc1   : > { %2800 = vst [vmem:[#allocation13_spill] sm:$0xff] %v2327_v35 }
  0xc4   : > { %743 = vmax.xlane.f32.xlu1 %v742_v9  ;;  %644 = vmax.xlane.f32.xlu0 %v643_v43  ;;  %v2330_v9 = vld [vmem:[%s2007_s30 + $0x80] sm:$0xff]  ;;  %v781_v43 = vsel %vm633_vm1, %v2327_v35, -inf }
  0xc8   : > { %788 = vmax.xlane.f32.xlu1 %v787_v50  ;;  %689 = vmax.xlane.f32.xlu0 %v688_v55  ;;  %v682_v50 = vsel %vm633_vm1, %v2330_v9, -inf  ;;  %v2337_v55 = vld [vmem:[%s2007_s30 + $0x108] sm:$0xff] }
  0xc9   : > { %2801 = vst [vmem:[#allocation14_spill] sm:$0xff] %v2337_v55  ;;  %v733_v5 = vsel %vm633_vm1, %v2337_v55, -inf }
  0xcc   : > { %740 = vmax.xlane.f32.xlu1 %v739_v2  ;;  %641 = vmax.xlane.f32.xlu0 %v640_v13  ;;  %v634_v2 = vsel %vm633_vm1, %v2021_v1, -inf  ;;  %v2344_v13 = vld [vmem:[%s2007_s30 + $0x2f8] sm:$0xff]  ;;  %v2361_v1 = vld [vmem:[%s2007_s30 + $0x100] sm:$0xff] }
  0xcd   : > { %2805 = vst [vmem:[#allocation18_spill] sm:$0xff] %v2361_v1 }
  0xd0   : > { %785 = vmax.xlane.f32.xlu1 %v784_v14  ;;  %686 = vmax.xlane.f32.xlu0 %v685_v8  ;;  %v2347_v14 = vld [vmem:[%s2007_s30 + $0x180] sm:$0xff] }
  0xd1   : > { %2802 = vst [vmem:[#allocation15_spill] sm:$0xff] %v2347_v14 }
  0xd4   : > { %737 = vmax.xlane.f32.xlu1 %v736_v0  ;;  %638 = vmax.xlane.f32.xlu0 %v637_v31  ;;  %v919_v31 = vsel %vm633_vm1, %v2344_v13, -inf }
  0xd8   : > { %782 = vmax.xlane.f32.xlu1 %v781_v43  ;;  %683 = vmax.xlane.f32.xlu0 %v682_v50  ;;  %v778_v43 = vsel %vm633_vm1, %v2347_v14, -inf  ;;  %v2358_v50 = vld [vmem:[%s2007_s30 + $0x278] sm:$0xff] }
  0xdc   : > { %734 = vmax.xlane.f32.xlu1 %v733_v5  ;;  %635 = vmax.xlane.f32.xlu0 %v634_v2  ;;  %v871_v2 = vsel %vm633_vm1, %v2358_v50, -inf }
  0xdd   : > { %v2349_v8 = vpop.xlane.xlu1 %352  ;;  %v2351_v0 = vpop.xlane.xlu0 %346 }
  0xde   : > { %2803 = vst [vmem:[#allocation16_spill] sm:$0xff] %v2349_v8  ;;  %2804 = vst [vmem:[#allocation17_spill] sm:$0xff] %v2351_v0  ;;  %v730_v0 = vsel %vm633_vm1, %v2361_v1, -inf  ;;  %v2372_v8 = vld [vmem:[%s2007_s30 + $0x2f0] sm:$0xff] }
  0xe0   : > { %920 = vmax.xlane.f32.xlu1 %v919_v31  ;;  %779 = vmax.xlane.f32.xlu0 %v778_v43  ;;  %v916_v31 = vsel %vm633_vm1, %v2372_v8, -inf  ;;  %v438_v43 = vsel %vm344_vm0, %v2061_v17, -inf }
  0xe1   : > { %v2363_v55 = vpop.xlane.xlu1 %355  ;;  %v2365_v5 = vpop.xlane.xlu0 %349 }
  0xe2   : > { %2806 = vst [vmem:[#allocation19_spill] sm:$0xff] %v2363_v55  ;;  %2807 = vst [vmem:[#allocation20_spill] sm:$0xff] %v2365_v5  ;;  %v2383_v5 = vld [vmem:[%s2007_s30 + $0x270] sm:$0xff] }
  0xe4   : > { %872 = vmax.xlane.f32.xlu1 %v871_v2  ;;  %731 = vmax.xlane.f32.xlu0 %v730_v0  ;;  %v868_v0 = vsel %vm633_vm1, %v2383_v5, -inf  ;;  %v390_v2 = vsel %vm344_vm0, %v2058_v16, -inf  ;;  %v2405_v16 = vld [vmem:[%s2007_s30 + $0x268] sm:$0xff] }
  0xe5   : > { %v2374_v14 = vpop.xlane.xlu1 %361  ;;  %v2376_v35 = vpop.xlane.xlu0 %358  ;;  %v865_v62 = vsel %vm633_vm1, %v2405_v16, -inf }
  0xe6   : > { %2808 = vst [vmem:[#allocation21_spill] sm:$0xff] %v2374_v14  ;;  %2809 = vst [vmem:[#allocation22_spill] sm:$0xff] %v2376_v35  ;;  %v2394_v35 = vld [vmem:[%s2007_s30 + $0x2e8] sm:$0xff]  ;;  %v2396_v14 = vld [vmem:[#allocation6] sm:$0xff] }
  0xe7   : > { %v925_v17 = vcombine.high %v2396_v14, %v2396_v14  ;;  %v913_v22 = vsel %vm633_vm1, %v2394_v35, -inf }
  0xe8   : > { %917 = vmax.xlane.f32.xlu1 %v916_v31  ;;  %439 = vmax.xlane.f32.xlu0 %v438_v43 }
  0xe9   : > { %v2385_v55 = vpop.xlane.xlu1 %367  ;;  %v2387_v1 = vpop.xlane.xlu0 %364  ;;  %995 = vmatprep.mubr.f32.mxu0 %v925_v17 }
  0xea   : > { %2810 = vst [vmem:[#allocation23_spill] sm:$0xff] %v2385_v55  ;;  %2811 = vst [vmem:[#allocation24_spill] sm:$0xff] %v2387_v1  ;;  %v435_v1 = vsel %vm344_vm0, %v2071_v21, -inf  ;;  %v387_v55 = vsel %vm344_vm0, %v2081_v25, -inf  ;;  %v2414_v21 = vld [vmem:[#allocation6 + $0x8] sm:$0xff]  ;;  %v432_v25 = vsel %vm344_vm0, %v2091_v29, -inf }
  0xeb   : > { %v926_v17 = vcombine.high %v2414_v21, %v2414_v21 }
  0xec   : > { %869 = vmax.xlane.f32.xlu1 %v868_v0  ;;  %391 = vmax.xlane.f32.xlu0 %v390_v2 }
  0xed   : > { %v681_v31 = vpop.xlane.xlu1 %680  ;;  %v729_v43 = vpop.xlane.xlu0 %728  ;;  %1065 = vmatprep.mubr.f32.mxu1 %v926_v17 }
  0xee   : > { %1459 = vmatprep.subr.mxu0 %v729_v43  ;;  %v2423_v43 = vld [vmem:[%s2007_s30 + $0x260] sm:$0xff] }
  0xef   : > { %1460 = vmatpush3.msra.mxu0 %v681_v31  ;;  %v910_v31 = vsel %vm633_vm1, %v2412_v58, -inf }
  0xf0   : > { %914 = vmax.xlane.f32.xlu1 %v913_v22  ;;  %436 = vmax.xlane.f32.xlu0 %v435_v1 }
  0xf1   : > { %v825_v0 = vpop.xlane.xlu1 %824  ;;  %v726_v2 = vpop.xlane.xlu0 %725 }
  0xf2   : > { %1461 = vmatprep.subr.mxu0 %v726_v2  ;;  %1494 = vmatprep.subr.mxu1 %v825_v0  ;;  %v384_v2 = vsel %vm344_vm0, %v2101_v33, -inf }
  0xf4   : > { %866 = vmax.xlane.f32.xlu1 %v865_v62  ;;  %388 = vmax.xlane.f32.xlu0 %v387_v55  ;;  %v862_v55 = vsel %vm633_vm1, %v2423_v43, -inf }
  0xf5   : > { %v777_v22 = vpop.xlane.xlu1 %776  ;;  %v678_v1 = vpop.xlane.xlu0 %677 }
  0xf6   : > { %1462 = vmatpush3.msra.mxu0 %v678_v1  ;;  %1495 = vmatpush3.msra.mxu1 %v777_v22  ;;  %v907_v22 = vsel %vm633_vm1, %v2430_v46, -inf  ;;  %v429_v1 = vsel %vm344_vm0, %v2111_v37, -inf }
  0xf8   : > { %911 = vmax.xlane.f32.xlu1 %v910_v31  ;;  %433 = vmax.xlane.f32.xlu0 %v432_v25  ;;  %v2437_v31 = vld [vmem:[%s2007_s30 + $0x258] sm:$0xff] }
  0xf9   : > { %v822_v0 = vpop.xlane.xlu1 %821  ;;  %v723_v62 = vpop.xlane.xlu0 %722 }
  0xfa   : > { %1463 = vmatprep.subr.mxu0 %v723_v62  ;;  %1496 = vmatprep.subr.mxu1 %v822_v0  ;;  %v859_v0 = vsel %vm633_vm1, %v2437_v31, -inf  ;;  %v381_v62 = vsel %vm344_vm0, %v2121_v41, -inf }
  0xfc   : > { %863 = vmax.xlane.f32.xlu1 %v862_v55  ;;  %385 = vmax.xlane.f32.xlu0 %v384_v2  ;;  %v2444_v55 = vld [vmem:[%s2007_s30 + $0x2d0] sm:$0xff] }
  0xfd   : > { %v774_v29 = vpop.xlane.xlu1 %773  ;;  %v675_v17 = vpop.xlane.xlu0 %674 }
  0xfe   : > { %1464 = vmatpush3.msra.mxu0 %v675_v17  ;;  %1497 = vmatpush3.msra.mxu1 %v774_v29  ;;  %v904_v29 = vsel %vm633_vm1, %v2444_v55, -inf  ;;  %v426_v17 = vsel %vm344_vm0, %v2131_v45, -inf }
 0x100   : > { %908 = vmax.xlane.f32.xlu1 %v907_v22  ;;  %430 = vmax.xlane.f32.xlu0 %v429_v1  ;;  %v2451_v22 = vld [vmem:[%s2007_s30 + $0x250] sm:$0xff] }
 0x101   : > { %v819_v33 = vpop.xlane.xlu1 %818  ;;  %v720_v25 = vpop.xlane.xlu0 %719 }
 0x102   : > { %1465 = vmatprep.subr.mxu0 %v720_v25  ;;  %1498 = vmatprep.subr.mxu1 %v819_v33  ;;  %v856_v33 = vsel %vm633_vm1, %v2451_v22, -inf  ;;  %v378_v25 = vsel %vm344_vm0, %v2141_v49, -inf }
 0x104   : > { %860 = vmax.xlane.f32.xlu1 %v859_v0  ;;  %382 = vmax.xlane.f32.xlu0 %v381_v62  ;;  %v2458_v0 = vld [vmem:[%s2007_s30 + $0x2c8] sm:$0xff] }
 0x105   : > { %v771_v37 = vpop.xlane.xlu1 %770  ;;  %v672_v2 = vpop.xlane.xlu0 %671 }
 0x106   : > { %1466 = vmatpush3.msra.mxu0 %v672_v2  ;;  %1499 = vmatpush3.msra.mxu1 %v771_v37  ;;  %v901_v37 = vsel %vm633_vm1, %v2458_v0, -inf  ;;  %v423_v2 = vsel %vm344_vm0, %v2151_v53, -inf }
 0x108   : > { %905 = vmax.xlane.f32.xlu1 %v904_v29  ;;  %427 = vmax.xlane.f32.xlu0 %v426_v17  ;;  %v2465_v29 = vld [vmem:[%s2007_s30 + $0x248] sm:$0xff] }
 0x109   : > { %v816_v41 = vpop.xlane.xlu1 %815  ;;  %v717_v1 = vpop.xlane.xlu0 %716 }
 0x10a   : > { %1467 = vmatprep.subr.mxu0 %v717_v1  ;;  %1500 = vmatprep.subr.mxu1 %v816_v41  ;;  %v853_v41 = vsel %vm633_vm1, %v2465_v29, -inf  ;;  %v375_v1 = vsel %vm344_vm0, %v2161_v57, -inf }
 0x10c   : > { %857 = vmax.xlane.f32.xlu1 %v856_v33  ;;  %379 = vmax.xlane.f32.xlu0 %v378_v25  ;;  %v2472_v33 = vld [vmem:[%s2007_s30 + $0x2c0] sm:$0xff] }
 0x10d   : > { %v768_v45 = vpop.xlane.xlu1 %767  ;;  %v669_v62 = vpop.xlane.xlu0 %668 }
 0x10e   : > { %1468 = vmatpush3.msra.mxu0 %v669_v62  ;;  %1501 = vmatpush3.msra.mxu1 %v768_v45  ;;  %v898_v45 = vsel %vm633_vm1, %v2472_v33, -inf  ;;  %v420_v62 = vsel %vm344_vm0, %v2171_v61, -inf }
 0x110   : > { %902 = vmax.xlane.f32.xlu1 %v901_v37  ;;  %424 = vmax.xlane.f32.xlu0 %v423_v2  ;;  %v2479_v37 = vld [vmem:[%s2007_s30 + $0x240] sm:$0xff] }
 0x111   : > { %v813_v49 = vpop.xlane.xlu1 %812  ;;  %v714_v17 = vpop.xlane.xlu0 %713 }
 0x112   : > { %1469 = vmatprep.subr.mxu0 %v714_v17  ;;  %1502 = vmatprep.subr.mxu1 %v813_v49  ;;  %v850_v49 = vsel %vm633_vm1, %v2479_v37, -inf  ;;  %v372_v17 = vsel %vm344_vm0, %v2181_v4, -inf }
 0x114   : > { %854 = vmax.xlane.f32.xlu1 %v853_v41  ;;  %376 = vmax.xlane.f32.xlu0 %v375_v1  ;;  %v2486_v41 = vld [vmem:[%s2007_s30 + $0x2b8] sm:$0xff] }
 0x115   : > { %v765_v53 = vpop.xlane.xlu1 %764  ;;  %v666_v25 = vpop.xlane.xlu0 %665 }
 0x116   : > { %1470 = vmatpush3.msra.mxu0 %v666_v25  ;;  %1503 = vmatpush3.msra.mxu1 %v765_v53  ;;  %v895_v53 = vsel %vm633_vm1, %v2486_v41, -inf  ;;  %v417_v25 = vsel %vm344_vm0, %v2191_v11, -inf }
 0x118   : > { %899 = vmax.xlane.f32.xlu1 %v898_v45  ;;  %421 = vmax.xlane.f32.xlu0 %v420_v62  ;;  %v2493_v45 = vld [vmem:[%s2007_s30 + $0x238] sm:$0xff] }
 0x119   : > { %v810_v57 = vpop.xlane.xlu1 %809  ;;  %v711_v2 = vpop.xlane.xlu0 %710 }
 0x11a   : > { %1471 = vmatprep.subr.mxu0 %v711_v2  ;;  %1504 = vmatprep.subr.mxu1 %v810_v57  ;;  %v847_v57 = vsel %vm633_vm1, %v2493_v45, -inf  ;;  %v369_v2 = vsel %vm344_vm0, %v2201_v19, -inf }
 0x11c   : > { %851 = vmax.xlane.f32.xlu1 %v850_v49  ;;  %373 = vmax.xlane.f32.xlu0 %v372_v17  ;;  %v2500_v49 = vld [vmem:[%s2007_s30 + $0x2b0] sm:$0xff] }
 0x11d   : > { %v762_v61 = vpop.xlane.xlu1 %761  ;;  %v663_v1 = vpop.xlane.xlu0 %662 }
 0x11e   : > { %1472 = vmatpush3.msra.mxu0 %v663_v1  ;;  %1505 = vmatpush3.msra.mxu1 %v762_v61  ;;  %v892_v61 = vsel %vm633_vm1, %v2500_v49, -inf  ;;  %v414_v1 = vsel %vm344_vm0, %v2211_v27, -inf  ;;  %v2517_v27 = vld [vmem:[%s2007_s30 + $0x2a8] sm:$0xff] }
 0x120   : > { %896 = vmax.xlane.f32.xlu1 %v895_v53  ;;  %418 = vmax.xlane.f32.xlu0 %v417_v25  ;;  %v2507_v53 = vld [vmem:[%s2007_s30 + $0x230] sm:$0xff] }
 0x121   : > { %v807_v4 = vpop.xlane.xlu1 %806  ;;  %v708_v62 = vpop.xlane.xlu0 %707 }
 0x122   : > { %1473 = vmatprep.subr.mxu0 %v708_v62  ;;  %1506 = vmatprep.subr.mxu1 %v807_v4  ;;  %v411_v4 = vsel %vm344_vm0, %v2228_v42, -inf  ;;  %v844_v62 = vsel %vm633_vm1, %v2507_v53, -inf  ;;  %v889_v42 = vsel %vm633_vm1, %v2517_v27, -inf }
 0x124   : > { %848 = vmax.xlane.f32.xlu1 %v847_v57  ;;  %370 = vmax.xlane.f32.xlu0 %v369_v2  ;;  %v2514_v57 = vld [vmem:[%s2007_s30 + $0x228] sm:$0xff] }
 0x125   : > { %v759_v11 = vpop.xlane.xlu1 %758  ;;  %v660_v17 = vpop.xlane.xlu0 %659 }
 0x126   : > { %1474 = vmatpush3.msra.mxu0 %v660_v17  ;;  %1507 = vmatpush3.msra.mxu1 %v759_v11  ;;  %v841_v17 = vsel %vm633_vm1, %v2514_v57, -inf }
 0x128   : > { %893 = vmax.xlane.f32.xlu1 %v892_v61  ;;  %415 = vmax.xlane.f32.xlu0 %v414_v1  ;;  %v2524_v61 = vld [vmem:[%s2007_s30 + $0x2a0] sm:$0xff] }
 0x129   : > { %v804_v19 = vpop.xlane.xlu1 %803  ;;  %v705_v25 = vpop.xlane.xlu0 %704  ;;  %2812 = vst [vmem:[#allocation25_spill] sm:$0xff] %v2524_v61 }
 0x12a   : > { %1475 = vmatprep.subr.mxu0 %v705_v25  ;;  %1508 = vmatprep.subr.mxu1 %v804_v19  ;;  %v886_v25 = vsel %vm633_vm1, %v2524_v61, -inf  ;;  %v2538_v61 = vld [vmem:[%s2007_s30 + $0x218] sm:$0xff] }
 0x12b   : > { %2813 = vst [vmem:[#allocation26_spill] sm:$0xff] %v2538_v61 }
 0x12c   : > { %412 = vmax.xlane.f32.xlu1 %v411_v4  ;;  %845 = vmax.xlane.f32.xlu0 %v844_v62  ;;  %v408_v4 = vsel %vm344_vm0, %v2245_v54, -inf  ;;  %v2531_v62 = vld [vmem:[%s2007_s30 + $0x220] sm:$0xff]  ;;  %v2541_v54 = vld [vmem:[%s2007_s30 + $0x298] sm:$0xff] }
 0x12d   : > { %v756_v2 = vpop.xlane.xlu1 %755  ;;  %v657_v11 = vpop.xlane.xlu0 %656 }
 0x12e   : > { %1476 = vmatpush3.msra.mxu0 %v657_v11  ;;  %1509 = vmatpush3.msra.mxu1 %v756_v2 }
 0x130   : > { %842 = vmax.xlane.f32.xlu1 %v841_v17  ;;  %890 = vmax.xlane.f32.xlu0 %v889_v42  ;;  %v405_v17 = vsel %vm344_vm0, %v2262_v6, -inf  ;;  %v838_v42 = vsel %vm633_vm1, %v2531_v62, -inf  ;;  %v883_v6 = vsel %vm633_vm1, %v2541_v54, -inf }
 0x131   : > { %v801_v1 = vpop.xlane.xlu1 %800  ;;  %v702_v19 = vpop.xlane.xlu0 %701 }
 0x132   : > { %1477 = vmatprep.subr.mxu0 %v702_v19  ;;  %1510 = vmatprep.subr.mxu1 %v801_v1 }
 0x134   : > { %887 = vmax.xlane.f32.xlu1 %v886_v25  ;;  %409 = vmax.xlane.f32.xlu0 %v408_v4  ;;  %v835_v25 = vsel %vm633_vm1, %v2538_v61, -inf  ;;  %v2548_v4 = vld [vmem:[%s2007_s30 + $0x290] sm:$0xff] }
 0x135   : > { %v753_v2 = vpop.xlane.xlu1 %752  ;;  %v654_v11 = vpop.xlane.xlu0 %653  ;;  %2814 = vst [vmem:[#allocation27_spill] sm:$0xff] %v2548_v4  ;;  %v2555_v61 = vld [vmem:[%s2007_s30 + $0x210] sm:$0xff] }
 0x136   : > { %1478 = vmatpush3.msra.mxu0 %v654_v11  ;;  %1511 = vmatpush3.msra.mxu1 %v753_v2 }
 0x138   : > { %406 = vmax.xlane.f32.xlu1 %v405_v17  ;;  %839 = vmax.xlane.f32.xlu0 %v838_v42  ;;  %v880_v17 = vsel %vm633_vm1, %v2548_v4, -inf  ;;  %v402_v42 = vsel %vm344_vm0, %v2279_v30, -inf  ;;  %v2562_v4 = vld [vmem:[%s2007_s30 + $0x208] sm:$0xff] }
 0x139   : > { %v798_v1 = vpop.xlane.xlu1 %797  ;;  %v699_v19 = vpop.xlane.xlu0 %698  ;;  %2815 = vst [vmem:[#allocation28_spill] sm:$0xff] %v2562_v4  ;;  %v2565_v30 = vld [vmem:[%s2007_s30 + $0x288] sm:$0xff] }
 0x13a   : > { %1479 = vmatprep.subr.mxu0 %v699_v19  ;;  %1512 = vmatprep.subr.mxu1 %v798_v1 }
 0x13c   : > { %836 = vmax.xlane.f32.xlu1 %v835_v25  ;;  %884 = vmax.xlane.f32.xlu0 %v883_v6  ;;  %v399_v25 = vsel %vm344_vm0, %v2296_v12, -inf  ;;  %v832_v6 = vsel %vm633_vm1, %v2555_v61, -inf  ;;  %v877_v12 = vsel %vm633_vm1, %v2565_v30, -inf }
 0x13d   : > { %v750_v2 = vpop.xlane.xlu1 %749  ;;  %v651_v11 = vpop.xlane.xlu0 %650 }
 0x13e   : > { %1480 = vmatpush3.msra.mxu0 %v651_v11  ;;  %1513 = vmatpush3.msra.mxu1 %v750_v2 }
 0x140   : > { %881 = vmax.xlane.f32.xlu1 %v880_v17  ;;  %403 = vmax.xlane.f32.xlu0 %v402_v42  ;;  %v829_v17 = vsel %vm633_vm1, %v2562_v4, -inf  ;;  %v2572_v42 = vld [vmem:[%s2007_s30 + $0x280] sm:$0xff] }
 0x141   : > { %v795_v1 = vpop.xlane.xlu1 %794  ;;  %v696_v19 = vpop.xlane.xlu0 %695  ;;  %2816 = vst [vmem:[#allocation29_spill] sm:$0xff] %v2572_v42  ;;  %v2579_v4 = vld [vmem:[%s2007_s30 + $0x200] sm:$0xff] }
 0x142   : > { %1481 = vmatprep.subr.mxu0 %v696_v19  ;;  %1514 = vmatprep.subr.mxu1 %v795_v1 }
 0x144   : > { %400 = vmax.xlane.f32.xlu1 %v399_v25  ;;  %833 = vmax.xlane.f32.xlu0 %v832_v6  ;;  %v874_v25 = vsel %vm633_vm1, %v2572_v42, -inf  ;;  %v396_v6 = vsel %vm344_vm0, %v2313_v7, -inf }
 0x145   : > { %v747_v2 = vpop.xlane.xlu1 %746  ;;  %v648_v11 = vpop.xlane.xlu0 %647 }
 0x146   : > { %1482 = vmatpush3.msra.mxu0 %v648_v11  ;;  %1515 = vmatpush3.msra.mxu1 %v747_v2 }
 0x148   : > { %830 = vmax.xlane.f32.xlu1 %v829_v17  ;;  %878 = vmax.xlane.f32.xlu0 %v877_v12  ;;  %v393_v17 = vsel %vm344_vm0, %v2330_v9, -inf  ;;  %v826_v12 = vsel %vm633_vm1, %v2579_v4, -inf }
 0x149   : > { %v792_v1 = vpop.xlane.xlu1 %791  ;;  %v693_v19 = vpop.xlane.xlu0 %692 }
 0x14a   : > { %1483 = vmatprep.subr.mxu0 %v693_v19  ;;  %1516 = vmatprep.subr.mxu1 %v792_v1  ;;  %v534_v1 = vsel %vm344_vm0, %v2068_v20, -inf  ;;  %v486_v19 = vsel %vm344_vm0, %v2078_v24, -inf  ;;  %v483_v24 = vsel %vm344_vm0, %v2098_v32, -inf }
 0x14c   : > { %875 = vmax.xlane.f32.xlu1 %v874_v25  ;;  %397 = vmax.xlane.f32.xlu0 %v396_v6  ;;  %v531_v6 = vsel %vm344_vm0, %v2088_v28, -inf }
 0x14d   : > { %v744_v11 = vpop.xlane.xlu1 %743  ;;  %v645_v2 = vpop.xlane.xlu0 %644 }
 0x14e   : > { %1484 = vmatpush3.msra.mxu0 %v645_v2  ;;  %1517 = vmatpush3.msra.mxu1 %v744_v11  ;;  %v630_v11 = vsel %vm344_vm0, %v2344_v13, -inf  ;;  %v528_v13 = vsel %vm344_vm0, %v2108_v36, -inf }
 0x150   : > { %394 = vmax.xlane.f32.xlu1 %v393_v17  ;;  %827 = vmax.xlane.f32.xlu0 %v826_v12  ;;  %v627_v12 = vsel %vm344_vm0, %v2372_v8, -inf }
 0x151   : > { %v789_v42 = vpop.xlane.xlu1 %788  ;;  %v690_v7 = vpop.xlane.xlu0 %689 }
 0x152   : > { %1485 = vmatprep.subr.mxu0 %v690_v7  ;;  %1518 = vmatprep.subr.mxu1 %v789_v42  ;;  %v582_v42 = vsel %vm344_vm0, %v2358_v50, -inf  ;;  %v480_v50 = vsel %vm344_vm0, %v2118_v40, -inf }
 0x154   : > { %535 = vmax.xlane.f32.xlu0 %v534_v1  ;;  %487 = vmax.xlane.f32.xlu1 %v486_v19  ;;  %v579_v1 = vsel %vm344_vm0, %v2383_v5, -inf  ;;  %v2605_v19 = vld [vmem:[#allocation6 + $0x10] sm:$0xff] }
 0x155   : > { %v741_v9 = vpop.xlane.xlu1 %740  ;;  %v642_v25 = vpop.xlane.xlu0 %641  ;;  %v927_v40 = vcombine.high %v2605_v19, %v2605_v19 }
 0x156   : > { %1486 = vmatpush3.msra.mxu0 %v642_v25  ;;  %1519 = vmatpush3.msra.mxu1 %v741_v9  ;;  %v525_v9 = vsel %vm344_vm0, %v2128_v44, -inf  ;;  %v624_v25 = vsel %vm344_vm0, %v2394_v35, -inf  ;;  %v576_v44 = vsel %vm344_vm0, %v2405_v16, -inf  ;;  %v2618_v35 = vld [vmem:[#allocation4] sm:$0xff] }
 0x158   : > { %532 = vmax.xlane.f32.xlu0 %v531_v6  ;;  %631 = vmax.xlane.f32.xlu1 %v630_v11  ;;  %v477_v11 = vsel %vm344_vm0, %v2138_v48, -inf  ;;  %v1144_v48 = vcombine.high %v2618_v35, %v2618_v35 }
 0x159   : > { %v786_v20 = vpop.xlane.xlu1 %785  ;;  %v687_v2 = vpop.xlane.xlu0 %686 }
 0x15a   : > { %1487 = vmatprep.subr.mxu0 %v687_v2  ;;  %1520 = vmatprep.subr.mxu1 %v786_v20 }
 0x15c   : > { %484 = vmax.xlane.f32.xlu0 %v483_v24  ;;  %583 = vmax.xlane.f32.xlu1 %v582_v42  ;;  %v621_v24 = vsel %vm344_vm0, %v2412_v58, -inf }
 0x15d   : > { %v738_v28 = vpop.xlane.xlu1 %737  ;;  %v639_v17 = vpop.xlane.xlu0 %638 }
 0x15e   : > { %1488 = vmatpush3.msra.mxu0 %v639_v17  ;;  %1521 = vmatpush3.msra.mxu1 %v738_v28  ;;  %v474_v28 = vsel %vm344_vm0, %v2158_v56, -inf }
 0x160   : > { %529 = vmax.xlane.f32.xlu0 %v528_v13  ;;  %628 = vmax.xlane.f32.xlu1 %v627_v12  ;;  %v618_v13 = vsel %vm344_vm0, %v2430_v46, -inf  ;;  %v516_v46 = vsel %vm344_vm0, %v2188_v10, -inf }
 0x161   : > { %v783_v32 = vpop.xlane.xlu1 %782  ;;  %v684_v7 = vpop.xlane.xlu0 %683 }
 0x162   : > { %1489 = vmatprep.subr.mxu0 %v684_v7  ;;  %1522 = vmatprep.subr.mxu1 %v783_v32  ;;  %v570_v32 = vsel %vm344_vm0, %v2437_v31, -inf  ;;  %v468_v31 = vsel %vm344_vm0, %v2198_v18, -inf }
 0x164   : > { %481 = vmax.xlane.f32.xlu0 %v480_v50  ;;  %580 = vmax.xlane.f32.xlu1 %v579_v1  ;;  %v615_v50 = vsel %vm344_vm0, %v2444_v55, -inf  ;;  %v513_v55 = vsel %vm344_vm0, %v2208_v26, -inf }
 0x165   : > { %v735_v36 = vpop.xlane.xlu1 %734  ;;  %v636_v8 = vpop.xlane.xlu0 %635 }
 0x166   : > { %1490 = vmatpush3.msra.mxu0 %v636_v8  ;;  %1523 = vmatpush3.msra.mxu1 %v735_v36  ;;  %v567_v36 = vsel %vm344_vm0, %v2451_v22, -inf  ;;  %v465_v22 = vsel %vm344_vm0, %v2218_v34, -inf }
 0x167   : > { %996 = vmatmul.mubr.f32.vlgmr.msra.gmra.mxu0 %v2396_v14  ;;  %v522_v14 = vsel %vm344_vm0, %v2148_v52, -inf  ;;  %v573_v52 = vsel %vm344_vm0, %v2423_v43, -inf  ;;  %v471_v43 = vsel %vm344_vm0, %v2178_v3, -inf }
 0x168   : > { %526 = vmax.xlane.f32.xlu0 %v525_v9  ;;  %625 = vmax.xlane.f32.xlu1 %v624_v25  ;;  %v612_v9 = vsel %vm344_vm0, %v2458_v0, -inf  ;;  %v510_v0 = vsel %vm344_vm0, %v2225_v39, -inf }
 0x169   : > { %v921_v5 = vpop.xlane.xlu1 %920  ;;  %v780_v6 = vpop.xlane.xlu0 %779  ;;  %1135 = vmatprep.mubr.f32.mxu0 %v927_v40  ;;  %v564_v40 = vsel %vm344_vm0, %v2465_v29, -inf  ;;  %v462_v29 = vsel %vm344_vm0, %v2235_v47, -inf }
 0x16a   : > { %1524 = vmatprep.subr.mxu1 %v780_v6  ;;  %1529 = vmatprep.subr.mxu0 %v921_v5  ;;  %v609_v6 = vsel %vm344_vm0, %v2472_v33, -inf  ;;  %v507_v33 = vsel %vm344_vm0, %v2242_v51, -inf }
 0x16c   : > { %478 = vmax.xlane.f32.xlu0 %v477_v11  ;;  %577 = vmax.xlane.f32.xlu1 %v576_v44  ;;  %v561_v44 = vsel %vm344_vm0, %v2479_v37, -inf  ;;  %v459_v37 = vsel %vm344_vm0, %v2252_v59, -inf }
 0x16d   : > { %v873_v20 = vpop.xlane.xlu1 %872  ;;  %v732_v2 = vpop.xlane.xlu0 %731 }
 0x16e   : > { %1525 = vmatpush3.msra.mxu1 %v732_v2  ;;  %1530 = vmatpush3.msra.mxu0 %v873_v20  ;;  %v606_v2 = vsel %vm344_vm0, %v2486_v41, -inf  ;;  %v504_v41 = vsel %vm344_vm0, %v2259_v63, -inf }
 0x16f   : > { %1066 = vmatmul.mubr.f32.vlgmr.msra.gmra.mxu1 %v2414_v21  ;;  %v519_v21 = vsel %vm344_vm0, %v2168_v60, -inf }
 0x170   : > { %523 = vmax.xlane.f32.xlu0 %v522_v14  ;;  %622 = vmax.xlane.f32.xlu1 %v621_v24  ;;  %v558_v24 = vsel %vm344_vm0, %v2493_v45, -inf  ;;  %v456_v45 = vsel %vm344_vm0, %v2269_v15, -inf }
 0x171   : > { %v918_v16 = vpop.xlane.xlu1 %917  ;;  %v440_v42 = vpop.xlane.xlu0 %439  ;;  %1214 = vmatprep.mubr.f32.mxu1 %v1144_v48 }
 0x172   : > { %1564 = vmatprep.subr.mxu1 %v440_v42  ;;  %1531 = vmatprep.subr.mxu0 %v918_v16  ;;  %v603_v16 = vsel %vm344_vm0, %v2500_v49, -inf  ;;  %v501_v49 = vsel %vm344_vm0, %v2276_v23, -inf }
 0x174   : > { %475 = vmax.xlane.f32.xlu0 %v474_v28  ;;  %574 = vmax.xlane.f32.xlu1 %v573_v52  ;;  %v555_v28 = vsel %vm344_vm0, %v2507_v53, -inf  ;;  %v453_v53 = vsel %vm344_vm0, %v2286_v38, -inf }
 0x175   : > { %v870_v58 = vpop.xlane.xlu1 %869  ;;  %v392_v17 = vpop.xlane.xlu0 %391 }
 0x176   : > { %1565 = vmatpush3.msra.mxu1 %v392_v17  ;;  %1532 = vmatpush3.msra.mxu0 %v870_v58  ;;  %v600_v58 = vsel %vm344_vm0, %v2517_v27, -inf }
 0x178   : > { %520 = vmax.xlane.f32.xlu0 %v519_v21  ;;  %619 = vmax.xlane.f32.xlu1 %v618_v13  ;;  %v552_v21 = vsel %vm344_vm0, %v2514_v57, -inf }
 0x179   : > { %v915_v56 = vpop.xlane.xlu1 %914  ;;  %v437_v12 = vpop.xlane.xlu0 %436 }
 0x17a   : > { %1566 = vmatprep.subr.mxu1 %v437_v12  ;;  %1533 = vmatprep.subr.mxu0 %v915_v56  ;;  %v2817_v56 = vld [vmem:[#allocation9_spill] sm:$0xff] }
 0x17b   : > { %v498_v27 = vsel %vm344_vm0, %v2817_v56, -inf  ;;  %v2818_v12 = vld [vmem:[#allocation25_spill] sm:$0xff] }
 0x17c   : > { %472 = vmax.xlane.f32.xlu0 %v471_v43  ;;  %571 = vmax.xlane.f32.xlu1 %v570_v32  ;;  %v597_v43 = vsel %vm344_vm0, %v2818_v12, -inf  ;;  %v2837_v12 = vld [vmem:[#allocation17_spill] sm:$0xff] }
 0x17d   : > { %v867_v60 = vpop.xlane.xlu1 %866  ;;  %v389_v7 = vpop.xlane.xlu0 %388 }
 0x17e   : > { %1567 = vmatpush3.msra.mxu1 %v389_v7  ;;  %1534 = vmatpush3.msra.mxu0 %v867_v60  ;;  %v2819_v60 = vld [vmem:[#allocation10_spill] sm:$0xff]  ;;  %v549_v7 = vsel %vm344_vm0, %v2531_v62, -inf }
 0x17f   : > { %v450_v57 = vsel %vm344_vm0, %v2819_v60, -inf }
 0x180   : > { %517 = vmax.xlane.f32.xlu0 %v516_v46  ;;  %616 = vmax.xlane.f32.xlu1 %v615_v50  ;;  %v2820_v46 = vld [vmem:[#allocation23_spill] sm:$0xff] }
 0x181   : > { %v912_v3 = vpop.xlane.xlu1 %911  ;;  %v434_v1 = vpop.xlane.xlu0 %433 }
 0x182   : > { %1568 = vmatprep.subr.mxu1 %v434_v1  ;;  %1535 = vmatprep.subr.mxu0 %v912_v3  ;;  %v2821_v1 = vld [vmem:[#allocation11_spill] sm:$0xff] }
 0x184   : > { %469 = vmax.xlane.f32.xlu0 %v468_v31  ;;  %568 = vmax.xlane.f32.xlu1 %v567_v36  ;;  %v495_v31 = vsel %vm344_vm0, %v2821_v1, -inf  ;;  %v594_v36 = vsel %vm344_vm0, %v2541_v54, -inf }
 0x185   : > { %v864_v10 = vpop.xlane.xlu1 %863  ;;  %v386_v8 = vpop.xlane.xlu0 %385 }
 0x186   : > { %1569 = vmatpush3.msra.mxu1 %v386_v8  ;;  %1536 = vmatpush3.msra.mxu0 %v864_v10  ;;  %v2822_v10 = vld [vmem:[#allocation24_spill] sm:$0xff] }
 0x188   : > { %514 = vmax.xlane.f32.xlu0 %v513_v55  ;;  %613 = vmax.xlane.f32.xlu1 %v612_v9  ;;  %v2823_v55 = vld [vmem:[#allocation12_spill] sm:$0xff] }
 0x189   : > { %v909_v18 = vpop.xlane.xlu1 %908  ;;  %v431_v25 = vpop.xlane.xlu0 %430  ;;  %v447_v9 = vsel %vm344_vm0, %v2823_v55, -inf }
 0x18a   : > { %1570 = vmatprep.subr.mxu1 %v431_v25  ;;  %1537 = vmatprep.subr.mxu0 %v909_v18  ;;  %v2824_v18 = vld [vmem:[#allocation26_spill] sm:$0xff] }
 0x18b   : > { %v546_v25 = vsel %vm344_vm0, %v2824_v18, -inf }
 0x18c   : > { %466 = vmax.xlane.f32.xlu0 %v465_v22  ;;  %565 = vmax.xlane.f32.xlu1 %v564_v40  ;;  %v2825_v40 = vld [vmem:[#allocation13_spill] sm:$0xff] }
 0x18d   : > { %v861_v26 = vpop.xlane.xlu1 %860  ;;  %v383_v5 = vpop.xlane.xlu0 %382 }
 0x18e   : > { %1571 = vmatpush3.msra.mxu1 %v383_v5  ;;  %1538 = vmatpush3.msra.mxu0 %v861_v26  ;;  %v492_v26 = vsel %vm344_vm0, %v2825_v40, -inf  ;;  %v2826_v5 = vld [vmem:[#allocation27_spill] sm:$0xff] }
 0x190   : > { %511 = vmax.xlane.f32.xlu0 %v510_v0  ;;  %610 = vmax.xlane.f32.xlu1 %v609_v6  ;;  %v591_v0 = vsel %vm344_vm0, %v2826_v5, -inf  ;;  %v2827_v6 = vld [vmem:[#allocation21_spill] sm:$0xff] }
 0x191   : > { %v906_v34 = vpop.xlane.xlu1 %905  ;;  %v428_v11 = vpop.xlane.xlu0 %427 }
 0x192   : > { %1572 = vmatprep.subr.mxu1 %v428_v11  ;;  %1539 = vmatprep.subr.mxu0 %v906_v34 }
 0x194   : > { %463 = vmax.xlane.f32.xlu0 %v462_v29  ;;  %562 = vmax.xlane.f32.xlu1 %v561_v44  ;;  %v2828_v29 = vld [vmem:[#allocation14_spill] sm:$0xff] }
 0x195   : > { %v858_v39 = vpop.xlane.xlu1 %857  ;;  %v380_v20 = vpop.xlane.xlu0 %379  ;;  %v444_v44 = vsel %vm344_vm0, %v2828_v29, -inf }
 0x196   : > { %1573 = vmatpush3.msra.mxu1 %v380_v20  ;;  %1540 = vmatpush3.msra.mxu0 %v858_v39  ;;  %v543_v39 = vsel %vm344_vm0, %v2555_v61, -inf  ;;  %v2829_v20 = vld [vmem:[#allocation22_spill] sm:$0xff] }
 0x198   : > { %508 = vmax.xlane.f32.xlu0 %v507_v33  ;;  %607 = vmax.xlane.f32.xlu1 %v606_v2 }
 0x199   : > { %v903_v47 = vpop.xlane.xlu1 %902  ;;  %v425_v14 = vpop.xlane.xlu0 %424 }
 0x19a   : > { %1574 = vmatprep.subr.mxu1 %v425_v14  ;;  %1541 = vmatprep.subr.mxu0 %v903_v47  ;;  %v2830_v47 = vld [vmem:[#allocation15_spill] sm:$0xff] }
 0x19b   : > { %v489_v14 = vsel %vm344_vm0, %v2830_v47, -inf }
 0x19c   : > { %460 = vmax.xlane.f32.xlu0 %v459_v37  ;;  %559 = vmax.xlane.f32.xlu1 %v558_v24  ;;  %v588_v37 = vsel %vm344_vm0, %v2565_v30, -inf }
 0x19d   : > { %v855_v51 = vpop.xlane.xlu1 %854  ;;  %v377_v48 = vpop.xlane.xlu0 %376 }
 0x19e   : > { %1575 = vmatpush3.msra.mxu1 %v377_v48  ;;  %1542 = vmatpush3.msra.mxu0 %v855_v51  ;;  %v2831_v51 = vld [vmem:[#allocation18_spill] sm:$0xff] }
 0x19f   : > { %v441_v48 = vsel %vm344_vm0, %v2831_v51, -inf }
 0x1a0   : > { %505 = vmax.xlane.f32.xlu0 %v504_v41  ;;  %604 = vmax.xlane.f32.xlu1 %v603_v16  ;;  %v2832_v41 = vld [vmem:[#allocation28_spill] sm:$0xff] }
 0x1a1   : > { %v900_v59 = vpop.xlane.xlu1 %899  ;;  %v422_v42 = vpop.xlane.xlu0 %421  ;;  %v540_v16 = vsel %vm344_vm0, %v2832_v41, -inf }
 0x1a2   : > { %1576 = vmatprep.subr.mxu1 %v422_v42  ;;  %1543 = vmatprep.subr.mxu0 %v900_v59  ;;  %v2833_v59 = vld [vmem:[#allocation19_spill] sm:$0xff] }
 0x1a4   : > { %457 = vmax.xlane.f32.xlu0 %v456_v45  ;;  %556 = vmax.xlane.f32.xlu1 %v555_v28  ;;  %v2834_v45 = vld [vmem:[#allocation29_spill] sm:$0xff] }
 0x1a5   : > { %v852_v63 = vpop.xlane.xlu1 %851  ;;  %v374_v52 = vpop.xlane.xlu0 %373  ;;  %v585_v28 = vsel %vm344_vm0, %v2834_v45, -inf }
 0x1a6   : > { %1577 = vmatpush3.msra.mxu1 %v374_v52  ;;  %1544 = vmatpush3.msra.mxu0 %v852_v63  ;;  %v537_v63 = vsel %vm344_vm0, %v2579_v4, -inf  ;;  %v2835_v52 = vld [vmem:[#allocation16_spill] sm:$0xff] }
 0x1a8   : > { %502 = vmax.xlane.f32.xlu0 %v501_v49  ;;  %601 = vmax.xlane.f32.xlu1 %v600_v58 }
 0x1a9   : > { %v897_v15 = vpop.xlane.xlu1 %896  ;;  %v419_v17 = vpop.xlane.xlu0 %418 }
 0x1aa   : > { %1578 = vmatprep.subr.mxu1 %v419_v17  ;;  %1545 = vmatprep.subr.mxu0 %v897_v15 }
 0x1ac   : > { %454 = vmax.xlane.f32.xlu0 %v453_v53  ;;  %553 = vmax.xlane.f32.xlu1 %v552_v21  ;;  %v2729_v53 = vld [vmem:[#allocation4 + $0x8] sm:$0xff] }
 0x1ad   : > { %v849_v23 = vpop.xlane.xlu1 %848  ;;  %v371_v13 = vpop.xlane.xlu0 %370  ;;  %v2836_v21 = vld [vmem:[#allocation20_spill] sm:$0xff]  ;;  %v1145_v4 = vcombine.high %v2729_v53, %v2729_v53 }
 0x1ae   : > { %1579 = vmatpush3.msra.mxu1 %v371_v13  ;;  %1546 = vmatpush3.msra.mxu0 %v849_v23  ;;  %v2734_v23 = vld [vmem:[#allocation4 + $0x10] sm:$0xff] }
 0x1b0   : > { %499 = vmax.xlane.f32.xlu0 %v498_v27  ;;  %598 = vmax.xlane.f32.xlu1 %v597_v43  ;;  %v1146_v27 = vcombine.high %v2734_v23, %v2734_v23 }
 0x1b1   : > { %v894_v38 = vpop.xlane.xlu1 %893  ;;  %v416_v32 = vpop.xlane.xlu0 %415 }
 0x1b2   : > { %1580 = vmatprep.subr.mxu1 %v416_v32  ;;  %1547 = vmatprep.subr.mxu0 %v894_v38 }
 0x1b3   : > { %1581 = vmatpush3.msra.mxu1 %v2820_v46 }
 0x1b4   : > { %451 = vmax.xlane.f32.xlu0 %v450_v57  ;;  %550 = vmax.xlane.f32.xlu1 %v549_v7 }
 0x1b5   : > { %v413_v50 = vpop.xlane.xlu1 %412  ;;  %v846_v3 = vpop.xlane.xlu0 %845 }
 0x1b6   : > { %1548 = vmatpush3.msra.mxu0 %v846_v3  ;;  %1582 = vmatprep.subr.mxu1 %v413_v50 }
 0x1b7   : > { %1583 = vmatpush3.msra.mxu1 %v2822_v10 }
 0x1b8   : > { %496 = vmax.xlane.f32.xlu0 %v495_v31  ;;  %595 = vmax.xlane.f32.xlu1 %v594_v36 }
 0x1b9   : > { %v843_v62 = vpop.xlane.xlu1 %842  ;;  %v891_v8 = vpop.xlane.xlu0 %890 }
 0x1ba   : > { %1549 = vmatprep.subr.mxu0 %v891_v8 }
 0x1bb   : > { %1550 = vmatpush3.msra.mxu0 %v843_v62 }
 0x1bc   : > { %448 = vmax.xlane.f32.xlu0 %v447_v9  ;;  %547 = vmax.xlane.f32.xlu1 %v546_v25 }
 0x1bd   : > { %v888_v22 = vpop.xlane.xlu1 %887  ;;  %v410_v54 = vpop.xlane.xlu0 %409 }
 0x1be   : > { %1584 = vmatprep.subr.mxu1 %v410_v54  ;;  %1551 = vmatprep.subr.mxu0 %v888_v22 }
 0x1bf   : > { %1585 = vmatpush3.msra.mxu1 %v2827_v6 }
 0x1c0   : > { %493 = vmax.xlane.f32.xlu0 %v492_v26  ;;  %592 = vmax.xlane.f32.xlu1 %v591_v0 }
 0x1c1   : > { %v407_v34 = vpop.xlane.xlu1 %406  ;;  %v840_v11 = vpop.xlane.xlu0 %839 }
 0x1c2   : > { %1552 = vmatpush3.msra.mxu0 %v840_v11  ;;  %1586 = vmatprep.subr.mxu1 %v407_v34 }
 0x1c3   : > { %1587 = vmatpush3.msra.mxu1 %v2829_v20 }
 0x1c4   : > { %445 = vmax.xlane.f32.xlu0 %v444_v44  ;;  %544 = vmax.xlane.f32.xlu1 %v543_v39 }
 0x1c5   : > { %v837_v33 = vpop.xlane.xlu1 %836  ;;  %v885_v2 = vpop.xlane.xlu0 %884 }
 0x1c6   : > { %1553 = vmatprep.subr.mxu0 %v885_v2 }
 0x1c7   : > { %1554 = vmatpush3.msra.mxu0 %v837_v33 }
 0x1c8   : > { %490 = vmax.xlane.f32.xlu0 %v489_v14  ;;  %589 = vmax.xlane.f32.xlu1 %v588_v37 }
 0x1c9   : > { %v882_v24 = vpop.xlane.xlu1 %881  ;;  %v404_v61 = vpop.xlane.xlu0 %403 }
 0x1ca   : > { %1588 = vmatprep.subr.mxu1 %v404_v61  ;;  %1555 = vmatprep.subr.mxu0 %v882_v24 }
 0x1cb   : > { %1589 = vmatpush3.msra.mxu1 %v2833_v59 }
 0x1cc   : > { %442 = vmax.xlane.f32.xlu0 %v441_v48  ;;  %541 = vmax.xlane.f32.xlu1 %v540_v16 }
 0x1cd   : > { %v401_v42 = vpop.xlane.xlu1 %400  ;;  %v834_v30 = vpop.xlane.xlu0 %833 }
 0x1ce   : > { %1556 = vmatpush3.msra.mxu0 %v834_v30  ;;  %1590 = vmatprep.subr.mxu1 %v401_v42 }
 0x1cf   : > { %1591 = vmatpush3.msra.mxu1 %v2835_v52 }
 0x1d0   : > { %586 = vmax.xlane.f32.xlu0 %v585_v28  ;;  %538 = vmax.xlane.f32.xlu1 %v537_v63 }
 0x1d1   : > { %v831_v49 = vpop.xlane.xlu1 %830  ;;  %v879_v58 = vpop.xlane.xlu0 %878 }
 0x1d2   : > { %1557 = vmatprep.subr.mxu0 %v879_v58 }
 0x1d3   : > { %1558 = vmatpush3.msra.mxu0 %v831_v49 }
 0x1d5   : > { %v876_v15 = vpop.xlane.xlu1 %875  ;;  %v398_v17 = vpop.xlane.xlu0 %397 }
 0x1d6   : > { %1592 = vmatprep.subr.mxu1 %v398_v17  ;;  %1559 = vmatprep.subr.mxu0 %v876_v15 }
 0x1d7   : > { %1593 = vmatpush3.msra.mxu1 %v2836_v21 }
 0x1d9   : > { %v395_v13 = vpop.xlane.xlu1 %394  ;;  %v828_v56 = vpop.xlane.xlu0 %827 }
 0x1da   : > { %1560 = vmatpush3.msra.mxu0 %v828_v56  ;;  %1594 = vmatprep.subr.mxu1 %v395_v13 }
 0x1db   : > { %1595 = vmatpush3.msra.mxu1 %v2837_v12  ;;  %1136 = vmatmul.mubr.f32.vlgmr.msra.gmra.mxu0 %v2605_v19 }
 0x1dc   : > { %1215 = vmatmul.mubr.f32.vlgmr.msra.gmra.mxu1 %v2618_v35  ;;  %1284 = vmatprep.mubr.f32.mxu0 %v1145_v4 }
 0x1dd   : > { %v536_v43 = vpop.xlane.xlu0 %535  ;;  %v488_v38 = vpop.xlane.xlu1 %487  ;;  %1354 = vmatprep.mubr.f32.mxu1 %v1146_v27 }
 0x1de   : > { %1599 = vmatprep.subr.mxu0 %v536_v43 }
 0x1df   : > { %1600 = vmatpush3.msra.mxu0 %v488_v38 }
 0x1e1   : > { %v533_v32 = vpop.xlane.xlu0 %532  ;;  %v632_v60 = vpop.xlane.xlu1 %631 }
 0x1e2   : > { %1601 = vmatprep.subr.mxu0 %v533_v32  ;;  %1634 = vmatprep.subr.mxu1 %v632_v60 }
 0x1e5   : > { %v485_v57 = vpop.xlane.xlu0 %484  ;;  %v584_v7 = vpop.xlane.xlu1 %583 }
 0x1e6   : > { %1602 = vmatpush3.msra.mxu0 %v485_v57  ;;  %1635 = vmatpush3.msra.mxu1 %v584_v7 }
 0x1e9   : > { %v530_v46 = vpop.xlane.xlu0 %529  ;;  %v629_v50 = vpop.xlane.xlu1 %628 }
 0x1ea   : > { %1603 = vmatprep.subr.mxu0 %v530_v46  ;;  %1636 = vmatprep.subr.mxu1 %v629_v50 }
 0x1ed   : > { %v482_v19 = vpop.xlane.xlu0 %481  ;;  %v581_v35 = vpop.xlane.xlu1 %580 }
 0x1ee   : > { %1604 = vmatpush3.msra.mxu0 %v482_v19  ;;  %1637 = vmatpush3.msra.mxu1 %v581_v35 }
 0x1f1   : > { %v527_v3 = vpop.xlane.xlu0 %526  ;;  %v626_v1 = vpop.xlane.xlu1 %625 }
 0x1f2   : > { %1605 = vmatprep.subr.mxu0 %v527_v3  ;;  %1638 = vmatprep.subr.mxu1 %v626_v1 }
 0x1f5   : > { %v479_v31 = vpop.xlane.xlu0 %478  ;;  %v578_v36 = vpop.xlane.xlu1 %577 }
 0x1f6   : > { %1606 = vmatpush3.msra.mxu0 %v479_v31  ;;  %1639 = vmatpush3.msra.mxu1 %v578_v36 }
 0x1f9   : > { %v524_v10 = vpop.xlane.xlu0 %523  ;;  %v623_v62 = vpop.xlane.xlu1 %622 }
 0x1fa   : > { %1607 = vmatprep.subr.mxu0 %v524_v10  ;;  %1640 = vmatprep.subr.mxu1 %v623_v62 }
 0x1fd   : > { %v476_v8 = vpop.xlane.xlu0 %475  ;;  %v575_v55 = vpop.xlane.xlu1 %574 }
 0x1fe   : > { %1608 = vmatpush3.msra.mxu0 %v476_v8  ;;  %1641 = vmatpush3.msra.mxu1 %v575_v55 }
 0x201   : > { %v521_v9 = vpop.xlane.xlu0 %520  ;;  %v620_v18 = vpop.xlane.xlu1 %619 }
 0x202   : > { %1609 = vmatprep.subr.mxu0 %v521_v9  ;;  %1642 = vmatprep.subr.mxu1 %v620_v18 }
 0x205   : > { %v473_v25 = vpop.xlane.xlu0 %472  ;;  %v572_v22 = vpop.xlane.xlu1 %571 }
 0x206   : > { %1610 = vmatpush3.msra.mxu0 %v473_v25  ;;  %1643 = vmatpush3.msra.mxu1 %v572_v22 }
 0x209   : > { %v518_v54 = vpop.xlane.xlu0 %517  ;;  %v617_v40 = vpop.xlane.xlu1 %616 }
 0x20a   : > { %1611 = vmatprep.subr.mxu0 %v518_v54  ;;  %1644 = vmatprep.subr.mxu1 %v617_v40  ;;  %v247_v54 = vld [vmem:[%s2767_s3] sm:$0xf] }
 0x20d   : > { %v470_v26 = vpop.xlane.xlu0 %469  ;;  %v569_v5 = vpop.xlane.xlu1 %568 }
 0x20e   : > { %1612 = vmatpush3.msra.mxu0 %v470_v26  ;;  %1645 = vmatpush3.msra.mxu1 %v569_v5 }
 0x211   : > { %v515_v0 = vpop.xlane.xlu0 %514  ;;  %v614_v6 = vpop.xlane.xlu1 %613 }
 0x212   : > { %1613 = vmatprep.subr.mxu0 %v515_v0  ;;  %1646 = vmatprep.subr.mxu1 %v614_v6 }
 0x215   : > { %v467_v34 = vpop.xlane.xlu0 %466  ;;  %v566_v11 = vpop.xlane.xlu1 %565 }
 0x216   : > { %1614 = vmatpush3.msra.mxu0 %v467_v34  ;;  %1647 = vmatpush3.msra.mxu1 %v566_v11 }
 0x219   : > { %v512_v29 = vpop.xlane.xlu0 %511  ;;  %v611_v44 = vpop.xlane.xlu1 %610 }
 0x21a   : > { %1615 = vmatprep.subr.mxu0 %v512_v29  ;;  %1648 = vmatprep.subr.mxu1 %v611_v44 }
 0x21d   : > { %v464_v39 = vpop.xlane.xlu0 %463  ;;  %v563_v20 = vpop.xlane.xlu1 %562 }
 0x21e   : > { %1616 = vmatpush3.msra.mxu0 %v464_v39  ;;  %1649 = vmatpush3.msra.mxu1 %v563_v20 }
 0x221   : > { %v509_v33 = vpop.xlane.xlu0 %508  ;;  %v608_v2 = vpop.xlane.xlu1 %607 }
 0x222   : > { %1617 = vmatprep.subr.mxu0 %v509_v33  ;;  %1650 = vmatprep.subr.mxu1 %v608_v2 }
 0x225   : > { %v461_v47 = vpop.xlane.xlu0 %460  ;;  %v560_v14 = vpop.xlane.xlu1 %559 }
 0x226   : > { %1618 = vmatpush3.msra.mxu0 %v461_v47  ;;  %1651 = vmatpush3.msra.mxu1 %v560_v14 }
 0x227   : > { %v1491_v32 = vpop.f32.mrf.mxu0 }
 0x229   : > { %v506_v37 = vpop.xlane.xlu0 %505  ;;  %v605_v24 = vpop.xlane.xlu1 %604 }
 0x22a   : > { %1619 = vmatprep.subr.mxu0 %v506_v37  ;;  %1652 = vmatprep.subr.mxu1 %v605_v24  ;;  %v1492_v60 = vpop.f32.mrf.mxu0 }
 0x22b   : > { %v1493_v50 = vadd.f32 %v1492_v60, %v1491_v32 }
 0x22d   : > { %v458_v61 = vpop.xlane.xlu0 %457  ;;  %v557_v51 = vpop.xlane.xlu1 %556 }
 0x22e   : > { %1620 = vmatpush3.msra.mxu0 %v458_v61  ;;  %1653 = vmatpush3.msra.mxu1 %v557_v51 }
 0x22f   : > { %v1526_v57 = vpop.f32.mrf.mxu1 }
 0x231   : > { %v503_v48 = vpop.xlane.xlu0 %502  ;;  %v602_v41 = vpop.xlane.xlu1 %601 }
 0x232   : > { %1621 = vmatprep.subr.mxu0 %v503_v48  ;;  %1654 = vmatprep.subr.mxu1 %v602_v41  ;;  %v1527_v7 = vpop.f32.mrf.mxu1 }
 0x233   : > { %v1528_v19 = vadd.f32 %v1527_v7, %v1526_v57 }
 0x235   : > { %v455_v16 = vpop.xlane.xlu0 %454  ;;  %v554_v59 = vpop.xlane.xlu1 %553  ;;  %v1068_v1 = vadd.f32 %v1528_v19, %v1493_v50 }
 0x236   : > { %1622 = vmatpush3.msra.mxu0 %v455_v16  ;;  %1655 = vmatpush3.msra.mxu1 %v554_v59 }
 0x239   : > { %v500_v42 = vpop.xlane.xlu0 %499  ;;  %v599_v30 = vpop.xlane.xlu1 %598 }
 0x23a   : > { %1623 = vmatprep.subr.mxu0 %v500_v42  ;;  %1656 = vmatprep.subr.mxu1 %v599_v30 }
 0x23d   : > { %v452_v45 = vpop.xlane.xlu0 %451  ;;  %v551_v28 = vpop.xlane.xlu1 %550 }
 0x23e   : > { %1624 = vmatpush3.msra.mxu0 %v452_v45  ;;  %1657 = vmatpush3.msra.mxu1 %v551_v28 }
 0x241   : > { %v497_v63 = vpop.xlane.xlu0 %496  ;;  %v596_v52 = vpop.xlane.xlu1 %595 }
 0x242   : > { %1625 = vmatprep.subr.mxu0 %v497_v63  ;;  %1658 = vmatprep.subr.mxu1 %v596_v52 }
 0x245   : > { %v449_v49 = vpop.xlane.xlu0 %448  ;;  %v548_v58 = vpop.xlane.xlu1 %547 }
 0x246   : > { %1626 = vmatpush3.msra.mxu0 %v449_v49  ;;  %1659 = vmatpush3.msra.mxu1 %v548_v58 }
 0x249   : > { %v494_v15 = vpop.xlane.xlu0 %493  ;;  %v593_v17 = vpop.xlane.xlu1 %592 }
 0x24a   : > { %1627 = vmatprep.subr.mxu0 %v494_v15  ;;  %1660 = vmatprep.subr.mxu1 %v593_v17 }
 0x24d   : > { %v446_v21 = vpop.xlane.xlu0 %445  ;;  %v545_v4 = vpop.xlane.xlu1 %544 }
 0x24e   : > { %1628 = vmatpush3.msra.mxu0 %v446_v21  ;;  %1661 = vmatpush3.msra.mxu1 %v545_v4 }
 0x251   : > { %v491_v13 = vpop.xlane.xlu0 %490  ;;  %v590_v56 = vpop.xlane.xlu1 %589 }
 0x252   : > { %1629 = vmatprep.subr.mxu0 %v491_v13  ;;  %1662 = vmatprep.subr.mxu1 %v590_v56 }
 0x255   : > { %v443_v27 = vpop.xlane.xlu0 %442  ;;  %v542_v12 = vpop.xlane.xlu1 %541 }
 0x256   : > { %1630 = vmatpush3.msra.mxu0 %v443_v27  ;;  %1663 = vmatpush3.msra.mxu1 %v542_v12 }
 0x257   : > { %1285 = vmatmul.mubr.f32.vlgmr.msra.gmra.mxu0 %v2729_v53 }
 0x259   : > { %v587_v43 = vpop.xlane.xlu0 %586  ;;  %v539_v38 = vpop.xlane.xlu1 %538 }
 0x25a   : > { %1664 = vmatprep.subr.mxu1 %v587_v43 }
 0x25b   : > { %1665 = vmatpush3.msra.mxu1 %v539_v38 }
 0x25c   : > { %1355 = vmatmul.mubr.f32.vlgmr.msra.gmra.mxu1 %v2734_v23 }
 0x29b   : > { %v1561_v46 = vpop.f32.mrf.mxu0 }
 0x29c   : > { %v1596_v3 = vpop.f32.mrf.mxu1 }
 0x29d   : > { %v1562_v35 = vpop.f32.mrf.mxu0 }
 0x29e   : > { %v1563_v31 = vadd.f32 %v1562_v35, %v1561_v46  ;;  %v1597_v53 = vpop.f32.mrf.mxu1 }
 0x29f   : > { %v1598_v62 = vadd.f32 %v1597_v53, %v1596_v3 }
 0x2a0   : > { %v1138_v10 = vadd.f32 %v1563_v31, %v1068_v1 }
 0x2a2   : > { %v1217_v9 = vadd.f32 %v1598_v62, %v1138_v10 }
 0x317   : > { %v1631_v36 = vpop.f32.mrf.mxu0 }
 0x319   : > { %v1632_v8 = vpop.f32.mrf.mxu0 }
 0x31a   : > { %v1633_v55 = vadd.f32 %v1632_v8, %v1631_v36 }
 0x31c   : > { %v1666_v23 = vpop.f32.mrf.mxu1  ;;  %v1287_v25 = vadd.f32 %v1633_v55, %v1217_v9 }
 0x31e   : > { %v1667_v18 = vpop.f32.mrf.mxu1 }
 0x31f   : > { %v1668_v22 = vadd.f32 %v1667_v18, %v1666_v23 }
 0x321   : > { %v1357_v40 = vadd.f32 %v1668_v22, %v1287_v25 }
 0x323   : > { %v1360_v26 = vadd.f32 %v1357_v40, %v247_v54 }
 0x325   : > { %1362 = vst.msk [vmem:[%s240_s29] sm:$0xf] %vm1361_vm2, %v1360_v26 }
 0x326 PF: > { %p15_p6 = scmp.ge.s32.totalorder %s1912_s20, 4   ;;  %s2838_s15 = smov %s1850_s16 }
 0x327   : > { %s2839_s16 = smov %s1854_s17  ;;  %s2840_s17 = smov %s1922_s23 }
 0x328   : > { %s2841_s18 = smov %s1912_s20  ;;  %17 = sbr.rel (!%p15_p6) target bundleno = 4 (0x4), region = 84 }
 0x32d   :  { %1382 = vsyncpa [#allocation3], 1 }
 0x32e   :  { %1384 = vsyncpa [#allocation3 + $0x1], 1 }
 0x32f   :  { %1385 = vsyncpa [#allocation5], 1 }

</bundles_post_ra>
